<compile_context>
chip_gen: v6e
topology: v6e:2x2x1
jax: 0.10.0
libtpu: 0.0.40
codegen_flags: <defaults>
</compile_context>

<pallas_src>
import functools

import numpy as np
import jax
import jax.numpy as jnp
from jax.experimental import pallas as pl
from jax.experimental.pallas import tpu as pltpu

# ----------------------------- configuration --------------------------------
K            = 3             # max_near_obj_num
MAX_DISTANCE = 0.5           # cfg['max_distance']
OCC_THRESH   = 0.6           # cfg['occ_thresh']
POOL_SHAPE   = 32            # cfg['pooling_shape'] (adaptive avg pool, 'avg')
REID_DIM     = 64            # raw Re-ID feature dim
TOPO_DIM     = 2 * K         # topology feature dim
BORDER       = TOPO_DIM + 4  # = 10, split point of node features
H_APP        = 32            # hidden dim of the appearance branch
H_TPY        = 16            # hidden dim of the topology branch
H_E          = 16            # hidden dim of edge features
EDGE_IN      = 5             # edge_feature_parts = ['xy_diff', 'iou', 'log_wh']
DEPTH        = 2             # cfg['message_passing']['depth']
LN_EPS       = 1e-5

H_NODE = H_APP + H_TPY       # 48: fused [app | tpy] node width
H_E2   = 2 * H_E             # 32: fused [app | tpy] edge width


# ----------------------------- Pallas kernel ---------------------------------
def _mm(a, b):
    return jnp.dot(a, b, preferred_element_type=jnp.float32)


def _ln_seg(x, avg_mat):
    """Per-branch LayerNorm without slices/concats.

    avg_mat is a constant block-averaging matrix, so x @ avg_mat gives every
    lane the mean of its own branch (and (x*x) @ avg_mat gives E[x^2]).
    One-pass variance: var = E[x^2] - m^2 (clamped).  gamma=1, beta=0.
    """
    m = _mm(x, avg_mat)
    msq = _mm(x * x, avg_mat)
    v = jnp.maximum(msq - m * m, 0.0)
    return (x - m) * jax.lax.rsqrt(v + LN_EPS)


def _frame_graph_kernel(
    reid_ref, tpy_ref, eat_ref, src_col_ref, dst_col_ref, dst_row_ref,
    w_app_ref, w_tpy_ref, b_enc_ref,       # node encoder (concat-free)
    w_ee_ref, b_ee_ref,                    # edge encoder (branches folded, 5->32)
    w_src_ref, w_dst_ref, w_ese_ref, b_eu_ref,   # edge update (project-then-gather)
    w_nun_ref, w_nua_ref, b_nu_ref,        # node update (concat-free)
    ln_n_ref, ln_e_ref,                    # block-averaging LN matrices
    node_out, edge_out,
):
    relu = lambda x: jnp.maximum(x, 0.0)
    f32 = jnp.float32
    bf16 = jnp.bfloat16

    npad = reid_ref.shape[0]
    epad = eat_ref.shape[0]

    # --- hoist every weight / bias load out of the unrolled depth loop -------
    w_app = w_app_ref[...]
    w_tpy = w_tpy_ref[...]
    b_enc = b_enc_ref[...]
    w_ee = w_ee_ref[...]
    b_ee = b_ee_ref[...]
    w_src = w_src_ref[...]
    w_dst = w_dst_ref[...]
    w_ese = w_ese_ref[...]
    b_eu = b_eu_ref[...]
    w_nun = w_nun_ref[...]
    w_nua = w_nua_ref[...]
    b_nu = b_nu_ref[...]
    ln_n = ln_n_ref[...]
    ln_e = ln_e_ref[...]

    # --- build one-hot gather/scatter matrices in-kernel from int32 indices --
    # (bf16 is exact for 0/1 values; padded edges carry index -1 -> all-zero
    #  row/column -> no contribution to real nodes/edges.)
    node_ids_lane = jax.lax.broadcasted_iota(jnp.int32, (epad, npad), 1)
    s_oh = jnp.where(node_ids_lane == src_col_ref[...], 1.0, 0.0).astype(bf16)  # (E,N)
    d_oh = jnp.where(node_ids_lane == dst_col_ref[...], 1.0, 0.0).astype(bf16)  # (E,N)
    node_ids_sub = jax.lax.broadcasted_iota(jnp.int32, (npad, epad), 0)
    dt_oh = jnp.where(node_ids_sub == dst_row_ref[...], 1.0, 0.0).astype(bf16)  # (N,E)

    # --- appearance input: F.normalize(dim=1) via rsqrt; pool folded into W --
    reid = reid_ref[...]
    reid_n = reid * jax.lax.rsqrt(
        jnp.sum(reid * reid, axis=1, keepdims=True) + 1e-24)

    # --- node / edge encoders (concat-free block matmuls) ---------------------
    h0 = relu(_mm(reid_n, w_app) + _mm(tpy_ref[...], w_tpy) + b_enc)   # (N,48)
    e0 = relu(_mm(eat_ref[...], w_ee) + b_ee)                          # (E,32)

    n = h0
    e = e0

    # --- message passing (MetaLayer: edge model, then node model) ------------
    for _ in range(DEPTH):
        # project-then-gather edge update: W applied on (N,*) before gather
        p_src = _mm(n, w_src)                                          # (N,32)
        p_dst = _mm(n, w_dst)                                          # (N,32)
        g_src = jnp.dot(s_oh, p_src.astype(bf16), preferred_element_type=f32)
        g_dst = jnp.dot(d_oh, p_dst.astype(bf16), preferred_element_type=f32)
        e_new = relu(g_src + g_dst + _mm(e, w_ese) + b_eu)             # (E,32)

        # dst scatter-add (segment sum) via bf16 one-hot matmul
        agg = jnp.dot(dt_oh, e_new.astype(bf16), preferred_element_type=f32)  # (N,32)
        n_new = relu(_mm(n, w_nun) + _mm(agg, w_nua) + b_nu)           # (N,48)

        # residual + per-branch LayerNorm (segmented, slice/concat-free)
        n = _ln_seg(n_new + h0, ln_n)
        e = _ln_seg(e_new + e0, ln_e)

    node_out[...] = n                                                  # (N,48)
    edge_out[...] = e[:, :H_E] + e[:, H_E:]                            # e_app + e_tpy


# ----------------------------- parameters (built & uploaded once) ------------
@functools.lru_cache(maxsize=None)
def _get_params():
    key = jax.random.PRNGKey(0)

    def linear(k, fin, fout):
        kw, kb = jax.random.split(k)
        lim = 1.0 / np.sqrt(fin)
        w = np.asarray(jax.random.uniform(kw, (fin, fout), jnp.float32, -lim, lim))
        b = np.asarray(jax.random.uniform(kb, (1, fout), jnp.float32, -lim, lim))
        return w, b

    ks = jax.random.split(key, 7)
    w_ea, b_ea = linear(ks[0], POOL_SHAPE, H_APP)          # node encoder (app)
    w_et, b_et = linear(ks[1], BORDER, H_TPY)              # node encoder (tpy)
    w_ee, b_ee = linear(ks[2], EDGE_IN, H_E)               # edge encoder
    w_eu_a, b_eu_a = linear(ks[3], 2 * H_APP + H_E, H_E)   # edge update (app)
    w_eu_t, b_eu_t = linear(ks[4], 2 * H_TPY + H_E, H_E)   # edge update (tpy)
    w_nu_a, b_nu_a = linear(ks[5], H_APP + H_E, H_APP)     # node update (app)
    w_nu_t, b_nu_t = linear(ks[6], H_TPY + H_E, H_TPY)     # node update (tpy)

    # adaptive avg pool (64 -> 32) folded into the appearance encoder weight
    pool = np.zeros((REID_DIM, POOL_SHAPE), np.float32)
    ratio = REID_DIM // POOL_SHAPE
    for o in range(POOL_SHAPE):
        pool[o * ratio:(o + 1) * ratio, o] = 1.0 / ratio

    # node encoder, concat-free: h0 = relu(reid_n @ w_app + tpy @ w_tpy + b_enc)
    w_app = np.zeros((REID_DIM, H_NODE), np.float32)
    w_app[:, :H_APP] = pool @ w_ea
    w_tpy = np.zeros((BORDER, H_NODE), np.float32)
    w_tpy[:, H_APP:] = w_et
    b_enc = np.concatenate([b_ea, b_et], axis=1)

    # edge encoder: branch duplication folded into the weight (5 -> 32)
    w_ee2 = np.concatenate([w_ee, w_ee], axis=1)
    b_ee2 = np.concatenate([b_ee, b_ee], axis=1)

    # edge update (project-then-gather), block-diagonal over branches:
    #   e_new = relu(S@(n@w_src) + D@(n@w_dst) + e@w_ese + b_eu)
    w_src = np.zeros((H_NODE, H_E2), np.float32)
    w_src[:H_APP, :H_E] = w_eu_a[:H_APP]
    w_src[H_APP:, H_E:] = w_eu_t[:H_TPY]
    w_dst = np.zeros((H_NODE, H_E2), np.float32)
    w_dst[:H_APP, :H_E] = w_eu_a[H_APP:2 * H_APP]
    w_dst[H_APP:, H_E:] = w_eu_t[H_TPY:2 * H_TPY]
    w_ese = np.zeros((H_E2, H_E2), np.float32)
    w_ese[:H_E, :H_E] = w_eu_a[2 * H_APP:]
    w_ese[H_E:, H_E:] = w_eu_t[2 * H_TPY:]
    b_eu = np.concatenate([b_eu_a, b_eu_t], axis=1)

    # node update, concat-free: n_new = relu(n @ w_nun + agg @ w_nua + b_nu)
    w_nun = np.zeros((H_NODE, H_NODE), np.float32)
    w_nun[:H_APP, :H_APP] = w_nu_a[:H_APP]
    w_nun[H_APP:, H_APP:] = w_nu_t[:H_TPY]
    w_nua = np.zeros((H_E2, H_NODE), np.float32)
    w_nua[:H_E, :H_APP] = w_nu_a[H_APP:]
    w_nua[H_E:, H_APP:] = w_nu_t[H_TPY:]
    b_nu = np.concatenate([b_nu_a, b_nu_t], axis=1)

    # segmented (per-branch) LayerNorm block-averaging matrices
    ln_n = np.zeros((H_NODE, H_NODE), np.float32)
    ln_n[:H_APP, :H_APP] = 1.0 / H_APP
    ln_n[H_APP:, H_APP:] = 1.0 / H_TPY
    ln_e = np.zeros((H_E2, H_E2), np.float32)
    ln_e[:H_E, :H_E] = 1.0 / H_E
    ln_e[H_E:, H_E:] = 1.0 / H_E

    d = dict(w_app=w_app, w_tpy=w_tpy, b_enc=b_enc, w_ee=w_ee2, b_ee=b_ee2,
             w_src=w_src, w_dst=w_dst, w_ese=w_ese, b_eu=b_eu,
             w_nun=w_nun, w_nua=w_nua, b_nu=b_nu, ln_n=ln_n, ln_e=ln_e)
    return {k: jnp.asarray(v) for k, v in d.items()}


_PARAM_ORDER = ["w_app", "w_tpy", "b_enc", "w_ee", "b_ee",
                "w_src", "w_dst", "w_ese", "b_eu",
                "w_nun", "w_nua", "b_nu", "ln_n", "ln_e"]


# ----------------------------- jit-cached pallas_call per shape bucket -------
def _bucket(x):
    x = max(int(x), 1)
    if x <= 256:
        return ((x + 7) // 8) * 8          # multiples of 8 (sublane tile)
    return ((x + 127) // 128) * 128        # multiples of 128 above 256


def _vmem_limit_bytes(npad, epad):
    onehot = 3 * npad * epad * 2                                   # bf16 S, D, D^T
    node_bytes = npad * 4 * (REID_DIM + BORDER + 8 * H_NODE)       # activations
    edge_bytes = epad * 4 * (EDGE_IN + 10 * H_E2)
    est = onehot + node_bytes + edge_bytes + (1 << 20)
    # 2x headroom for compiler temporaries; cap at v7x physical VMEM (64 MiB)
    return int(min(max(2 * est, 32 << 20), 64 << 20))


@functools.lru_cache(maxsize=None)
def _get_forward_fn(npad, epad):
    vmem = pl.BlockSpec(memory_space=pltpu.MemorySpace.VMEM)
    call = pl.pallas_call(
        _frame_graph_kernel,
        out_shape=(
            jax.ShapeDtypeStruct((npad, H_NODE), jnp.float32),
            jax.ShapeDtypeStruct((epad, H_E), jnp.float32),
        ),
        in_specs=[vmem] * (6 + len(_PARAM_ORDER)),
        out_specs=(vmem, vmem),
        compiler_params=pltpu.CompilerParams(
            vmem_limit_bytes=_vmem_limit_bytes(npad, epad)),
    )
    return jax.jit(call)


# ----------------------------- host-side graph build -------------------------
def _tlbr_to_xywh(p):
    q = p.copy()
    q[:, 0] = 0.5 * (p[:, 0] + p[:, 2])
    q[:, 1] = 0.5 * (p[:, 1] + p[:, 3])
    q[:, 2] = p[:, 2] - p[:, 0]
    q[:, 3] = p[:, 3] - p[:, 1]
    return q


def _bbox_distance(a, b):
    return float(np.hypot(a[0] - b[0], a[1] - b[1]))


def _bbox_angle(pc, p1, p2):
    v1 = p1[:2] - pc[:2]
    v2 = p2[:2] - pc[:2]
    n1, n2 = np.linalg.norm(v1), np.linalg.norm(v2)
    if n1 < 1e-9 or n2 < 1e-9:
        return 0.0
    c = np.clip(float(np.dot(v1, v2)) / (n1 * n2), -1.0, 1.0)
    return float(np.degrees(np.arccos(c)))


def _overlap_area(b1, b2):
    w = max(0.0, min(b1[2], b2[2]) - max(b1[0], b2[0]))
    h = max(0.0, min(b1[3], b2[3]) - max(b1[1], b2[1]))
    return w * h


def _box_iou(b):
    area = (b[:, 2] - b[:, 0]) * (b[:, 3] - b[:, 1])
    lt = np.maximum(b[:, None, :2], b[None, :, :2])
    rb = np.minimum(b[:, None, 2:], b[None, :, 2:])
    wh = np.clip(rb - lt, 0.0, None)
    inter = wh[..., 0] * wh[..., 1]
    return inter / (area[:, None] + area[None, :] - inter)


def _build_graph_host(tlbr, img_size):
    """Mirrors FrameGraph.build_graph (data-dependent part) in NumPy."""
    n = tlbr.shape[0]
    img_w, img_h = img_size
    thresh = MAX_DISTANCE * min(img_w, img_h)
    xywh = _tlbr_to_xywh(tlbr)

    occ = np.zeros((1, n), np.int32)
    topo = np.zeros((n, TOPO_DIM), np.float32)
    dists_all = []
    for i in range(n):
        dl = []
        for j in range(n):
            if j == i:
                continue
            d = _bbox_distance(xywh[i], xywh[j])
            if d > thresh:
                continue
            dl.append([d, j])
        dl.sort(key=lambda x: x[0])
        if len(dl):
            nearest = dl[0][1]
            ov = _overlap_area(tlbr[i], tlbr[nearest])
            if ov > xywh[i, 2] * xywh[i, 3] * OCC_THRESH:
                occ[0, i] = 1
        if len(dl) < K:
            dl += [[0.0, -1]] * (K - len(dl))
        elif len(dl) > K:
            dl = dl[:K]
        dists_all.append(dl)
        angles = []
        for j in range(1, K):
            if dl[j][1] == -1:
                break
            angles.append(_bbox_angle(xywh[i], xywh[dl[j - 1][1]], xywh[dl[j][1]]))
        angles += [0.0] * (K - len(angles))
        topo[i, :K] = [d[0] for d in dl]
        topo[i, K:] = angles

    topo[:, :K] /= img_h
    topo[:, K:] /= 360.0

    pos_normed = xywh.copy()
    pos_normed[:, 0] /= img_w
    pos_normed[:, 2] /= img_w
    pos_normed[:, 1] /= img_h
    pos_normed[:, 3] /= img_h
    node_tpy = np.concatenate([pos_normed, topo], axis=1).astype(np.float32)

    # edge index: nearest_k + unique (sorted, like torch.unique(dim=1))
    pairs = []
    for ic, item in enumerate(dists_all):
        for idx_obj, near in enumerate(item):
            if near[1] == -1:
                continue
            if not idx_obj < K:
                break
            pairs.append((ic, int(near[1])))
    if not pairs:
        pairs = [(0, 0)]          # matches reference's empty-edge fallback
    pairs = np.unique(np.asarray(pairs, np.int64), axis=0)
    edge_index = pairs.T          # (2, E)
    src, dst = edge_index[0], edge_index[1]

    # edge features: xy_diff, iou, log_wh
    xd = (xywh[src, 0] - xywh[dst, 0]) / img_w
    yd = (xywh[src, 1] - xywh[dst, 1]) / img_h
    iou = _box_iou(tlbr)[src, dst]
    logw = np.log(xywh[src, 2] / xywh[dst, 2])
    logh = np.log(xywh[src, 3] / xywh[dst, 3])
    edge_attr = np.stack([xd, yd, iou, logw, logh], axis=1).astype(np.float32)

    return node_tpy, edge_attr, edge_index.astype(np.int32), src, dst, occ


# ----------------------------- wrapper ---------------------------------------
def frame_graph_forward(reid_features, positions, confs, ori_img_size):
    """Equivalent of FrameGraph.inference(...)."""
    del confs  # unused by the reference forward (besides being passed around)
    tlbr = np.asarray(jax.device_get(positions), np.float32)
    reid_np = np.asarray(jax.device_get(reid_features), np.float32)
    node_tpy, edge_attr, edge_index, src, dst, occ = _build_graph_host(
        tlbr, ori_img_size)

    n = tlbr.shape[0]
    e = edge_attr.shape[0]
    npad = _bucket(n)
    epad = _bucket(e)

    # pad to static bucket sizes (padded rows all-zero, padded indices -1
    # -> zero one-hot row/column -> no contribution to real nodes/edges)
    reid_p = np.zeros((npad, REID_DIM), np.float32)
    reid_p[:n] = reid_np
    tpy_p = np.zeros((npad, BORDER), np.float32)
    tpy_p[:n] = node_tpy
    eat_p = np.zeros((epad, EDGE_IN), np.float32)
    eat_p[:e] = edge_attr

    src_col = np.full((epad, 1), -1, np.int32)
    src_col[:e, 0] = src
    dst_col = np.full((epad, 1), -1, np.int32)
    dst_col[:e, 0] = dst
    dst_row = np.full((1, epad), -1, np.int32)
    dst_row[0, :e] = dst

    params = _get_params()
    fn = _get_forward_fn(npad, epad)
    node48, e16 = fn(
        jnp.asarray(reid_p), jnp.asarray(tpy_p), jnp.asarray(eat_p),
        jnp.asarray(src_col), jnp.asarray(dst_col), jnp.asarray(dst_row),
        *[params[k] for k in _PARAM_ORDER])

    final_nodes = node48[:n]          # cat([app, tpy], dim=1), already fused
    final_edges = e16[:e]             # e_app + e_tpy (computed in kernel)
    return final_nodes, final_edges, jnp.asarray(edge_index), jnp.asarray(occ)


# ----------------------------- demo -------------------------------------------
if __name__ == "__main__":
    key = jax.random.PRNGKey(0)
    k1, k2, k3 = jax.random.split(key, 3)

    N = 8
    IMG = (64, 64)  # (w, h)
    reid = jax.random.normal(k1, (N, REID_DIM), jnp.float32)
    centers = jax.random.uniform(k2, (N, 2), jnp.float32, 14.0, 50.0)
    wh = jax.random.uniform(k3, (N, 2), jnp.float32, 6.0, 16.0)
    tlbr = jnp.concatenate([centers - wh / 2.0, centers + wh / 2.0], axis=1)
    confs = jnp.ones((N,), jnp.float32)

    nodes, edges, edge_index, occ = frame_graph_forward(reid, tlbr, confs, IMG)
    jax.block_until_ready((nodes, edges))
    assert nodes.shape == (N, H_APP + H_TPY)
    assert edges.shape[1] == H_E
    assert not bool(jnp.any(jnp.isnan(nodes))) and not bool(jnp.any(jnp.isnan(edges)))
    print("KERNEL_OK")
</pallas_src>

<mosaic_0001>
module attributes {stable_mosaic.version = 11 : i64} {
  func.func @_frame_graph_kernel(%arg0: memref<8x64xf32, #tpu.memory_space<vmem>>, %arg1: memref<8x10xf32, #tpu.memory_space<vmem>>, %arg2: memref<24x5xf32, #tpu.memory_space<vmem>>, %arg3: memref<24x1xi32, #tpu.memory_space<vmem>>, %arg4: memref<24x1xi32, #tpu.memory_space<vmem>>, %arg5: memref<1x24xi32, #tpu.memory_space<vmem>>, %arg6: memref<64x48xf32, #tpu.memory_space<vmem>>, %arg7: memref<10x48xf32, #tpu.memory_space<vmem>>, %arg8: memref<1x48xf32, #tpu.memory_space<vmem>>, %arg9: memref<5x32xf32, #tpu.memory_space<vmem>>, %arg10: memref<1x32xf32, #tpu.memory_space<vmem>>, %arg11: memref<48x32xf32, #tpu.memory_space<vmem>>, %arg12: memref<48x32xf32, #tpu.memory_space<vmem>>, %arg13: memref<32x32xf32, #tpu.memory_space<vmem>>, %arg14: memref<1x32xf32, #tpu.memory_space<vmem>>, %arg15: memref<48x48xf32, #tpu.memory_space<vmem>>, %arg16: memref<32x48xf32, #tpu.memory_space<vmem>>, %arg17: memref<1x48xf32, #tpu.memory_space<vmem>>, %arg18: memref<48x48xf32, #tpu.memory_space<vmem>>, %arg19: memref<32x32xf32, #tpu.memory_space<vmem>>, %arg20: memref<8x48xf32, #tpu.memory_space<vmem>>, %arg21: memref<24x16xf32, #tpu.memory_space<vmem>>) attributes {dimension_semantics = [], scalar_prefetch = 0 : i64, scratch_operands = 0 : i64, tpu.core_type = #tpu.core_type<tc>} {
    %c0 = arith.constant 0 : index
    %c0_0 = arith.constant 0 : index
    %0 = vector.load %arg6[%c0, %c0_0] : memref<64x48xf32, #tpu.memory_space<vmem>>, vector<64x48xf32>
    %c0_1 = arith.constant 0 : index
    %c0_2 = arith.constant 0 : index
    %1 = vector.load %arg7[%c0_1, %c0_2] : memref<10x48xf32, #tpu.memory_space<vmem>>, vector<10x48xf32>
    %c0_3 = arith.constant 0 : index
    %c0_4 = arith.constant 0 : index
    %2 = vector.load %arg8[%c0_3, %c0_4] : memref<1x48xf32, #tpu.memory_space<vmem>>, vector<1x48xf32>
    %c0_5 = arith.constant 0 : index
    %c0_6 = arith.constant 0 : index
    %3 = vector.load %arg9[%c0_5, %c0_6] : memref<5x32xf32, #tpu.memory_space<vmem>>, vector<5x32xf32>
    %c0_7 = arith.constant 0 : index
    %c0_8 = arith.constant 0 : index
    %4 = vector.load %arg10[%c0_7, %c0_8] : memref<1x32xf32, #tpu.memory_space<vmem>>, vector<1x32xf32>
    %c0_9 = arith.constant 0 : index
    %c0_10 = arith.constant 0 : index
    %5 = vector.load %arg11[%c0_9, %c0_10] : memref<48x32xf32, #tpu.memory_space<vmem>>, vector<48x32xf32>
    %c0_11 = arith.constant 0 : index
    %c0_12 = arith.constant 0 : index
    %6 = vector.load %arg12[%c0_11, %c0_12] : memref<48x32xf32, #tpu.memory_space<vmem>>, vector<48x32xf32>
    %c0_13 = arith.constant 0 : index
    %c0_14 = arith.constant 0 : index
    %7 = vector.load %arg13[%c0_13, %c0_14] : memref<32x32xf32, #tpu.memory_space<vmem>>, vector<32x32xf32>
    %c0_15 = arith.constant 0 : index
    %c0_16 = arith.constant 0 : index
    %8 = vector.load %arg14[%c0_15, %c0_16] : memref<1x32xf32, #tpu.memory_space<vmem>>, vector<1x32xf32>
    %c0_17 = arith.constant 0 : index
    %c0_18 = arith.constant 0 : index
    %9 = vector.load %arg15[%c0_17, %c0_18] : memref<48x48xf32, #tpu.memory_space<vmem>>, vector<48x48xf32>
    %c0_19 = arith.constant 0 : index
    %c0_20 = arith.constant 0 : index
    %10 = vector.load %arg16[%c0_19, %c0_20] : memref<32x48xf32, #tpu.memory_space<vmem>>, vector<32x48xf32>
    %c0_21 = arith.constant 0 : index
    %c0_22 = arith.constant 0 : index
    %11 = vector.load %arg17[%c0_21, %c0_22] : memref<1x48xf32, #tpu.memory_space<vmem>>, vector<1x48xf32>
    %c0_23 = arith.constant 0 : index
    %c0_24 = arith.constant 0 : index
    %12 = vector.load %arg18[%c0_23, %c0_24] : memref<48x48xf32, #tpu.memory_space<vmem>>, vector<48x48xf32>
    %c0_25 = arith.constant 0 : index
    %c0_26 = arith.constant 0 : index
    %13 = vector.load %arg19[%c0_25, %c0_26] : memref<32x32xf32, #tpu.memory_space<vmem>>, vector<32x32xf32>
    %14 = tpu.iota {dimensions = array<i32: 1>} : vector<24x8xi32>
    %c0_27 = arith.constant 0 : index
    %c0_28 = arith.constant 0 : index
    %15 = vector.load %arg3[%c0_27, %c0_28] : memref<24x1xi32, #tpu.memory_space<vmem>>, vector<24x1xi32>
    %16 = vector.broadcast %15 : vector<24x1xi32> to vector<24x8xi32>
    %17 = arith.cmpi eq, %14, %16 : vector<24x8xi32>
    %cst = arith.constant 1.000000e+00 : f32
    %cst_29 = arith.constant 0.000000e+00 : f32
    %18 = vector.broadcast %cst : f32 to vector<24x8xf32>
    %19 = vector.broadcast %cst_29 : f32 to vector<24x8xf32>
    %20 = arith.select %17, %18, %19 : vector<24x8xi1>, vector<24x8xf32>
    %21 = arith.truncf %20 : vector<24x8xf32> to vector<24x8xbf16>
    %c0_30 = arith.constant 0 : index
    %c0_31 = arith.constant 0 : index
    %22 = vector.load %arg4[%c0_30, %c0_31] : memref<24x1xi32, #tpu.memory_space<vmem>>, vector<24x1xi32>
    %23 = vector.broadcast %22 : vector<24x1xi32> to vector<24x8xi32>
    %24 = arith.cmpi eq, %14, %23 : vector<24x8xi32>
    %cst_32 = arith.constant 1.000000e+00 : f32
    %cst_33 = arith.constant 0.000000e+00 : f32
    %25 = vector.broadcast %cst_32 : f32 to vector<24x8xf32>
    %26 = vector.broadcast %cst_33 : f32 to vector<24x8xf32>
    %27 = arith.select %24, %25, %26 : vector<24x8xi1>, vector<24x8xf32>
    %28 = arith.truncf %27 : vector<24x8xf32> to vector<24x8xbf16>
    %29 = tpu.iota {dimensions = array<i32: 0>} : vector<8x24xi32>
    %c0_34 = arith.constant 0 : index
    %c0_35 = arith.constant 0 : index
    %30 = vector.load %arg5[%c0_34, %c0_35] : memref<1x24xi32, #tpu.memory_space<vmem>>, vector<1x24xi32>
    %31 = vector.broadcast %30 : vector<1x24xi32> to vector<8x24xi32>
    %32 = arith.cmpi eq, %29, %31 : vector<8x24xi32>
    %cst_36 = arith.constant 1.000000e+00 : f32
    %cst_37 = arith.constant 0.000000e+00 : f32
    %33 = vector.broadcast %cst_36 : f32 to vector<8x24xf32>
    %34 = vector.broadcast %cst_37 : f32 to vector<8x24xf32>
    %35 = arith.select %32, %33, %34 : vector<8x24xi1>, vector<8x24xf32>
    %36 = arith.truncf %35 : vector<8x24xf32> to vector<8x24xbf16>
    %c0_38 = arith.constant 0 : index
    %c0_39 = arith.constant 0 : index
    %37 = vector.load %arg0[%c0_38, %c0_39] : memref<8x64xf32, #tpu.memory_space<vmem>>, vector<8x64xf32>
    %38 = arith.mulf %37, %37 : vector<8x64xf32>
    %cst_40 = arith.constant dense<0.000000e+00> : vector<8xf32>
    %39 = vector.multi_reduction <add>, %38, %cst_40 [1] : vector<8x64xf32> to vector<8xf32>
    %40 = vector.shape_cast %39 : vector<8xf32> to vector<8x1xf32>
    %cst_41 = arith.constant 1.000000e-24 : f32
    %41 = vector.broadcast %cst_41 : f32 to vector<8x1xf32>
    %42 = arith.addf %40, %41 : vector<8x1xf32>
    %43 = math.rsqrt %42 : vector<8x1xf32>
    %44 = vector.broadcast %43 : vector<8x1xf32> to vector<8x64xf32>
    %45 = arith.mulf %37, %44 : vector<8x64xf32>
    %cst_42 = arith.constant dense<0.000000e+00> : vector<8x48xf32>
    %46 = tpu.matmul %45, %0, %cst_42 {dimension_numbers = #tpu.dot_dimension_numbers<[1], [0], [0], [1], [0, 0, 1, 1], [], []>} : vector<8x64xf32>, vector<64x48xf32>, vector<8x48xf32> -> vector<8x48xf32>
    %c0_43 = arith.constant 0 : index
    %c0_44 = arith.constant 0 : index
    %47 = vector.load %arg1[%c0_43, %c0_44] : memref<8x10xf32, #tpu.memory_space<vmem>>, vector<8x10xf32>
    %cst_45 = arith.constant dense<0.000000e+00> : vector<8x48xf32>
    %48 = tpu.matmul %47, %1, %cst_45 {dimension_numbers = #tpu.dot_dimension_numbers<[1], [0], [0], [1], [0, 0, 1, 1], [], []>} : vector<8x10xf32>, vector<10x48xf32>, vector<8x48xf32> -> vector<8x48xf32>
    %49 = arith.addf %46, %48 : vector<8x48xf32>
    %50 = vector.broadcast %2 : vector<1x48xf32> to vector<8x48xf32>
    %51 = arith.addf %49, %50 : vector<8x48xf32>
    %cst_46 = arith.constant 0.000000e+00 : f32
    %52 = vector.broadcast %cst_46 : f32 to vector<8x48xf32>
    %53 = arith.maximumf %51, %52 : vector<8x48xf32>
    %c0_47 = arith.constant 0 : index
    %c0_48 = arith.constant 0 : index
    %54 = vector.load %arg2[%c0_47, %c0_48] : memref<24x5xf32, #tpu.memory_space<vmem>>, vector<24x5xf32>
    %cst_49 = arith.constant dense<0.000000e+00> : vector<24x32xf32>
    %55 = tpu.matmul %54, %3, %cst_49 {dimension_numbers = #tpu.dot_dimension_numbers<[1], [0], [0], [1], [0, 0, 1, 1], [], []>} : vector<24x5xf32>, vector<5x32xf32>, vector<24x32xf32> -> vector<24x32xf32>
    %56 = vector.broadcast %4 : vector<1x32xf32> to vector<24x32xf32>
    %57 = arith.addf %55, %56 : vector<24x32xf32>
    %cst_50 = arith.constant 0.000000e+00 : f32
    %58 = vector.broadcast %cst_50 : f32 to vector<24x32xf32>
    %59 = arith.maximumf %57, %58 : vector<24x32xf32>
    %cst_51 = arith.constant dense<0.000000e+00> : vector<8x32xf32>
    %60 = tpu.matmul %53, %5, %cst_51 {dimension_numbers = #tpu.dot_dimension_numbers<[1], [0], [0], [1], [0, 0, 1, 1], [], []>} : vector<8x48xf32>, vector<48x32xf32>, vector<8x32xf32> -> vector<8x32xf32>
    %cst_52 = arith.constant dense<0.000000e+00> : vector<8x32xf32>
    %61 = tpu.matmul %53, %6, %cst_52 {dimension_numbers = #tpu.dot_dimension_numbers<[1], [0], [0], [1], [0, 0, 1, 1], [], []>} : vector<8x48xf32>, vector<48x32xf32>, vector<8x32xf32> -> vector<8x32xf32>
    %62 = arith.truncf %60 : vector<8x32xf32> to vector<8x32xbf16>
    %cst_53 = arith.constant dense<0.000000e+00> : vector<24x32xf32>
    %63 = tpu.matmul %21, %62, %cst_53 {dimension_numbers = #tpu.dot_dimension_numbers<[1], [0], [0], [1], [0, 0, 1, 1], [], []>} : vector<24x8xbf16>, vector<8x32xbf16>, vector<24x32xf32> -> vector<24x32xf32>
    %64 = arith.truncf %61 : vector<8x32xf32> to vector<8x32xbf16>
    %cst_54 = arith.constant dense<0.000000e+00> : vector<24x32xf32>
    %65 = tpu.matmul %28, %64, %cst_54 {dimension_numbers = #tpu.dot_dimension_numbers<[1], [0], [0], [1], [0, 0, 1, 1], [], []>} : vector<24x8xbf16>, vector<8x32xbf16>, vector<24x32xf32> -> vector<24x32xf32>
    %66 = arith.addf %63, %65 : vector<24x32xf32>
    %cst_55 = arith.constant dense<0.000000e+00> : vector<24x32xf32>
    %67 = tpu.matmul %59, %7, %cst_55 {dimension_numbers = #tpu.dot_dimension_numbers<[1], [0], [0], [1], [0, 0, 1, 1], [], []>} : vector<24x32xf32>, vector<32x32xf32>, vector<24x32xf32> -> vector<24x32xf32>
    %68 = arith.addf %66, %67 : vector<24x32xf32>
    %69 = vector.broadcast %8 : vector<1x32xf32> to vector<24x32xf32>
    %70 = arith.addf %68, %69 : vector<24x32xf32>
    %cst_56 = arith.constant 0.000000e+00 : f32
    %71 = vector.broadcast %cst_56 : f32 to vector<24x32xf32>
    %72 = arith.maximumf %70, %71 : vector<24x32xf32>
    %73 = arith.truncf %72 : vector<24x32xf32> to vector<24x32xbf16>
    %cst_57 = arith.constant dense<0.000000e+00> : vector<8x32xf32>
    %74 = tpu.matmul %36, %73, %cst_57 {dimension_numbers = #tpu.dot_dimension_numbers<[1], [0], [0], [1], [0, 0, 1, 1], [], []>} : vector<8x24xbf16>, vector<24x32xbf16>, vector<8x32xf32> -> vector<8x32xf32>
    %cst_58 = arith.constant dense<0.000000e+00> : vector<8x48xf32>
    %75 = tpu.matmul %53, %9, %cst_58 {dimension_numbers = #tpu.dot_dimension_numbers<[1], [0], [0], [1], [0, 0, 1, 1], [], []>} : vector<8x48xf32>, vector<48x48xf32>, vector<8x48xf32> -> vector<8x48xf32>
    %cst_59 = arith.constant dense<0.000000e+00> : vector<8x48xf32>
    %76 = tpu.matmul %74, %10, %cst_59 {dimension_numbers = #tpu.dot_dimension_numbers<[1], [0], [0], [1], [0, 0, 1, 1], [], []>} : vector<8x32xf32>, vector<32x48xf32>, vector<8x48xf32> -> vector<8x48xf32>
    %77 = arith.addf %75, %76 : vector<8x48xf32>
    %78 = vector.broadcast %11 : vector<1x48xf32> to vector<8x48xf32>
    %79 = arith.addf %77, %78 : vector<8x48xf32>
    %cst_60 = arith.constant 0.000000e+00 : f32
    %80 = vector.broadcast %cst_60 : f32 to vector<8x48xf32>
    %81 = arith.maximumf %79, %80 : vector<8x48xf32>
    %82 = arith.addf %81, %53 : vector<8x48xf32>
    %cst_61 = arith.constant dense<0.000000e+00> : vector<8x48xf32>
    %83 = tpu.matmul %82, %12, %cst_61 {dimension_numbers = #tpu.dot_dimension_numbers<[1], [0], [0], [1], [0, 0, 1, 1], [], []>} : vector<8x48xf32>, vector<48x48xf32>, vector<8x48xf32> -> vector<8x48xf32>
    %84 = arith.mulf %82, %82 : vector<8x48xf32>
    %cst_62 = arith.constant dense<0.000000e+00> : vector<8x48xf32>
    %85 = tpu.matmul %84, %12, %cst_62 {dimension_numbers = #tpu.dot_dimension_numbers<[1], [0], [0], [1], [0, 0, 1, 1], [], []>} : vector<8x48xf32>, vector<48x48xf32>, vector<8x48xf32> -> vector<8x48xf32>
    %86 = arith.mulf %83, %83 : vector<8x48xf32>
    %87 = arith.subf %85, %86 : vector<8x48xf32>
    %cst_63 = arith.constant 0.000000e+00 : f32
    %88 = vector.broadcast %cst_63 : f32 to vector<8x48xf32>
    %89 = arith.maximumf %87, %88 : vector<8x48xf32>
    %90 = arith.subf %82, %83 : vector<8x48xf32>
    %cst_64 = arith.constant 9.99999974E-6 : f32
    %91 = vector.broadcast %cst_64 : f32 to vector<8x48xf32>
    %92 = arith.addf %89, %91 : vector<8x48xf32>
    %93 = math.rsqrt %92 : vector<8x48xf32>
    %94 = arith.mulf %90, %93 : vector<8x48xf32>
    %95 = arith.addf %72, %59 : vector<24x32xf32>
    %cst_65 = arith.constant dense<0.000000e+00> : vector<24x32xf32>
    %96 = tpu.matmul %95, %13, %cst_65 {dimension_numbers = #tpu.dot_dimension_numbers<[1], [0], [0], [1], [0, 0, 1, 1], [], []>} : vector<24x32xf32>, vector<32x32xf32>, vector<24x32xf32> -> vector<24x32xf32>
    %97 = arith.mulf %95, %95 : vector<24x32xf32>
    %cst_66 = arith.constant dense<0.000000e+00> : vector<24x32xf32>
    %98 = tpu.matmul %97, %13, %cst_66 {dimension_numbers = #tpu.dot_dimension_numbers<[1], [0], [0], [1], [0, 0, 1, 1], [], []>} : vector<24x32xf32>, vector<32x32xf32>, vector<24x32xf32> -> vector<24x32xf32>
    %99 = arith.mulf %96, %96 : vector<24x32xf32>
    %100 = arith.subf %98, %99 : vector<24x32xf32>
    %cst_67 = arith.constant 0.000000e+00 : f32
    %101 = vector.broadcast %cst_67 : f32 to vector<24x32xf32>
    %102 = arith.maximumf %100, %101 : vector<24x32xf32>
    %103 = arith.subf %95, %96 : vector<24x32xf32>
    %cst_68 = arith.constant 9.99999974E-6 : f32
    %104 = vector.broadcast %cst_68 : f32 to vector<24x32xf32>
    %105 = arith.addf %102, %104 : vector<24x32xf32>
    %106 = math.rsqrt %105 : vector<24x32xf32>
    %107 = arith.mulf %103, %106 : vector<24x32xf32>
    %cst_69 = arith.constant dense<0.000000e+00> : vector<8x32xf32>
    %108 = tpu.matmul %94, %5, %cst_69 {dimension_numbers = #tpu.dot_dimension_numbers<[1], [0], [0], [1], [0, 0, 1, 1], [], []>} : vector<8x48xf32>, vector<48x32xf32>, vector<8x32xf32> -> vector<8x32xf32>
    %cst_70 = arith.constant dense<0.000000e+00> : vector<8x32xf32>
    %109 = tpu.matmul %94, %6, %cst_70 {dimension_numbers = #tpu.dot_dimension_numbers<[1], [0], [0], [1], [0, 0, 1, 1], [], []>} : vector<8x48xf32>, vector<48x32xf32>, vector<8x32xf32> -> vector<8x32xf32>
    %110 = arith.truncf %108 : vector<8x32xf32> to vector<8x32xbf16>
    %cst_71 = arith.constant dense<0.000000e+00> : vector<24x32xf32>
    %111 = tpu.matmul %21, %110, %cst_71 {dimension_numbers = #tpu.dot_dimension_numbers<[1], [0], [0], [1], [0, 0, 1, 1], [], []>} : vector<24x8xbf16>, vector<8x32xbf16>, vector<24x32xf32> -> vector<24x32xf32>
    %112 = arith.truncf %109 : vector<8x32xf32> to vector<8x32xbf16>
    %cst_72 = arith.constant dense<0.000000e+00> : vector<24x32xf32>
    %113 = tpu.matmul %28, %112, %cst_72 {dimension_numbers = #tpu.dot_dimension_numbers<[1], [0], [0], [1], [0, 0, 1, 1], [], []>} : vector<24x8xbf16>, vector<8x32xbf16>, vector<24x32xf32> -> vector<24x32xf32>
    %114 = arith.addf %111, %113 : vector<24x32xf32>
    %cst_73 = arith.constant dense<0.000000e+00> : vector<24x32xf32>
    %115 = tpu.matmul %107, %7, %cst_73 {dimension_numbers = #tpu.dot_dimension_numbers<[1], [0], [0], [1], [0, 0, 1, 1], [], []>} : vector<24x32xf32>, vector<32x32xf32>, vector<24x32xf32> -> vector<24x32xf32>
    %116 = arith.addf %114, %115 : vector<24x32xf32>
    %117 = vector.broadcast %8 : vector<1x32xf32> to vector<24x32xf32>
    %118 = arith.addf %116, %117 : vector<24x32xf32>
    %cst_74 = arith.constant 0.000000e+00 : f32
    %119 = vector.broadcast %cst_74 : f32 to vector<24x32xf32>
    %120 = arith.maximumf %118, %119 : vector<24x32xf32>
    %121 = arith.truncf %120 : vector<24x32xf32> to vector<24x32xbf16>
    %cst_75 = arith.constant dense<0.000000e+00> : vector<8x32xf32>
    %122 = tpu.matmul %36, %121, %cst_75 {dimension_numbers = #tpu.dot_dimension_numbers<[1], [0], [0], [1], [0, 0, 1, 1], [], []>} : vector<8x24xbf16>, vector<24x32xbf16>, vector<8x32xf32> -> vector<8x32xf32>
    %cst_76 = arith.constant dense<0.000000e+00> : vector<8x48xf32>
    %123 = tpu.matmul %94, %9, %cst_76 {dimension_numbers = #tpu.dot_dimension_numbers<[1], [0], [0], [1], [0, 0, 1, 1], [], []>} : vector<8x48xf32>, vector<48x48xf32>, vector<8x48xf32> -> vector<8x48xf32>
    %cst_77 = arith.constant dense<0.000000e+00> : vector<8x48xf32>
    %124 = tpu.matmul %122, %10, %cst_77 {dimension_numbers = #tpu.dot_dimension_numbers<[1], [0], [0], [1], [0, 0, 1, 1], [], []>} : vector<8x32xf32>, vector<32x48xf32>, vector<8x48xf32> -> vector<8x48xf32>
    %125 = arith.addf %123, %124 : vector<8x48xf32>
    %126 = vector.broadcast %11 : vector<1x48xf32> to vector<8x48xf32>
    %127 = arith.addf %125, %126 : vector<8x48xf32>
    %cst_78 = arith.constant 0.000000e+00 : f32
    %128 = vector.broadcast %cst_78 : f32 to vector<8x48xf32>
    %129 = arith.maximumf %127, %128 : vector<8x48xf32>
    %130 = arith.addf %129, %53 : vector<8x48xf32>
    %cst_79 = arith.constant dense<0.000000e+00> : vector<8x48xf32>
    %131 = tpu.matmul %130, %12, %cst_79 {dimension_numbers = #tpu.dot_dimension_numbers<[1], [0], [0], [1], [0, 0, 1, 1], [], []>} : vector<8x48xf32>, vector<48x48xf32>, vector<8x48xf32> -> vector<8x48xf32>
    %132 = arith.mulf %130, %130 : vector<8x48xf32>
    %cst_80 = arith.constant dense<0.000000e+00> : vector<8x48xf32>
    %133 = tpu.matmul %132, %12, %cst_80 {dimension_numbers = #tpu.dot_dimension_numbers<[1], [0], [0], [1], [0, 0, 1, 1], [], []>} : vector<8x48xf32>, vector<48x48xf32>, vector<8x48xf32> -> vector<8x48xf32>
    %134 = arith.mulf %131, %131 : vector<8x48xf32>
    %135 = arith.subf %133, %134 : vector<8x48xf32>
    %cst_81 = arith.constant 0.000000e+00 : f32
    %136 = vector.broadcast %cst_81 : f32 to vector<8x48xf32>
    %137 = arith.maximumf %135, %136 : vector<8x48xf32>
    %138 = arith.subf %130, %131 : vector<8x48xf32>
    %cst_82 = arith.constant 9.99999974E-6 : f32
    %139 = vector.broadcast %cst_82 : f32 to vector<8x48xf32>
    %140 = arith.addf %137, %139 : vector<8x48xf32>
    %141 = math.rsqrt %140 : vector<8x48xf32>
    %142 = arith.mulf %138, %141 : vector<8x48xf32>
    %143 = arith.addf %120, %59 : vector<24x32xf32>
    %cst_83 = arith.constant dense<0.000000e+00> : vector<24x32xf32>
    %144 = tpu.matmul %143, %13, %cst_83 {dimension_numbers = #tpu.dot_dimension_numbers<[1], [0], [0], [1], [0, 0, 1, 1], [], []>} : vector<24x32xf32>, vector<32x32xf32>, vector<24x32xf32> -> vector<24x32xf32>
    %145 = arith.mulf %143, %143 : vector<24x32xf32>
    %cst_84 = arith.constant dense<0.000000e+00> : vector<24x32xf32>
    %146 = tpu.matmul %145, %13, %cst_84 {dimension_numbers = #tpu.dot_dimension_numbers<[1], [0], [0], [1], [0, 0, 1, 1], [], []>} : vector<24x32xf32>, vector<32x32xf32>, vector<24x32xf32> -> vector<24x32xf32>
    %147 = arith.mulf %144, %144 : vector<24x32xf32>
    %148 = arith.subf %146, %147 : vector<24x32xf32>
    %cst_85 = arith.constant 0.000000e+00 : f32
    %149 = vector.broadcast %cst_85 : f32 to vector<24x32xf32>
    %150 = arith.maximumf %148, %149 : vector<24x32xf32>
    %151 = arith.subf %143, %144 : vector<24x32xf32>
    %cst_86 = arith.constant 9.99999974E-6 : f32
    %152 = vector.broadcast %cst_86 : f32 to vector<24x32xf32>
    %153 = arith.addf %150, %152 : vector<24x32xf32>
    %154 = math.rsqrt %153 : vector<24x32xf32>
    %155 = arith.mulf %151, %154 : vector<24x32xf32>
    %c0_87 = arith.constant 0 : index
    %c0_88 = arith.constant 0 : index
    %156 = vector.load %arg20[%c0_87, %c0_88] : memref<8x48xf32, #tpu.memory_space<vmem>>, vector<8x48xf32>
    tpu.vector_store %arg20[%c0_87, %c0_88], %142 {strides = array<i32>} : memref<8x48xf32, #tpu.memory_space<vmem>>, vector<8x48xf32>,
    %157 = vector.extract_strided_slice %155 {offsets = [0, 0], sizes = [24, 16], strides = [1, 1]} : vector<24x32xf32> to vector<24x16xf32>
    %158 = vector.extract_strided_slice %155 {offsets = [0, 16], sizes = [24, 16], strides = [1, 1]} : vector<24x32xf32> to vector<24x16xf32>
    %159 = arith.addf %157, %158 : vector<24x16xf32>
    %c0_89 = arith.constant 0 : index
    %c0_90 = arith.constant 0 : index
    %160 = vector.load %arg21[%c0_89, %c0_90] : memref<24x16xf32, #tpu.memory_space<vmem>>, vector<24x16xf32>
    tpu.vector_store %arg21[%c0_89, %c0_90], %159 {strides = array<i32>} : memref<24x16xf32, #tpu.memory_space<vmem>>, vector<24x16xf32>,
    return
  }
}

</mosaic_0001>

<bundles_post_ra>
// kernel: tpu_custom_call.1
= control target key start
LH: loop header
LB: loop body
LE: loop exit
PB: predicated region body
PF: predicated region fallthrough
CT: control target
= control target key end

     0   :  { %s3777_s0 = inlined_call_operand.vmem [shape: f32[8,64], index: 0, kind: input, shape index: {}]   ;;  %s3778_s1 = inlined_call_operand.vmem [shape: f32[8,10], index: 1, kind: input, shape index: {}]   ;;  %s3779_s2 = inlined_call_operand.vmem [shape: f32[24,5], index: 2, kind: input, shape index: {}]   ;;  %s3780_s3 = inlined_call_operand.vmem [shape: s32[24,1], index: 3, kind: input, shape index: {}]   ;;  %s3781_s4 = inlined_call_operand.vmem [shape: s32[24,1], index: 4, kind: input, shape index: {}]   ;;  %s3782_s5 = inlined_call_operand.vmem [shape: s32[1,24], index: 5, kind: input, shape index: {}]   ;;  %s3783_s6 = inlined_call_operand.vmem [shape: f32[64,48], index: 6, kind: input, shape index: {}]   ;;  %s3784_s7 = inlined_call_operand.vmem [shape: f32[10,48], index: 7, kind: input, shape index: {}]   ;;  %s3785_s8 = inlined_call_operand.vmem [shape: f32[1,48], index: 8, kind: input, shape index: {}]   ;;  %s3786_s9 = inlined_call_operand.vmem [shape: f32[5,32], index: 9, kind: input, shape index: {}]   ;;  %s3787_s10 = inlined_call_operand.vmem [shape: f32[1,32], index: 10, kind: input, shape index: {}]   ;;  %s3788_s11 = inlined_call_operand.vmem [shape: f32[48,32], index: 11, kind: input, shape index: {}]   ;;  %s3789_s12 = inlined_call_operand.vmem [shape: f32[48,32], index: 12, kind: input, shape index: {}]   ;;  %s3790_s13 = inlined_call_operand.vmem [shape: f32[32,32], index: 13, kind: input, shape index: {}]   ;;  %s3791_s14 = inlined_call_operand.vmem [shape: f32[1,32], index: 14, kind: input, shape index: {}]   ;;  %s3792_s15 = inlined_call_operand.vmem [shape: f32[48,48], index: 15, kind: input, shape index: {}]   ;;  %s3793_s16 = inlined_call_operand.vmem [shape: f32[32,48], index: 16, kind: input, shape index: {}]   ;;  %s3794_s17 = inlined_call_operand.vmem [shape: f32[1,48], index: 17, kind: input, shape index: {}]   ;;  %s3795_s18 = inlined_call_operand.vmem [shape: f32[48,48], index: 18, kind: input, shape index: {}]   ;;  %s3796_s19 = inlined_call_operand.vmem [shape: f32[32,32], index: 19, kind: input, shape index: {}]   ;;  %s3797_s20 = inlined_call_operand.hbm [shape: f32[8,48], index: 20, kind: output, shape index: {0}]   ;;  %s3798_s21 = inlined_call_operand.vmem [shape: f32[24,16], index: 21, kind: output, shape index: {1}]  }
   0x1   :  { %3802 = sst [smem:[#allocation5_spill]] %s3777_s0 }
   0x2   :  { %3803 = sst [smem:[#allocation6_spill]] %s3778_s1 }
   0x3   :  { %3804 = sst [smem:[#allocation7_spill]] %s3779_s2 }
   0x4   :  { %3805 = sst [smem:[#allocation8_spill]] %s3780_s3 }
   0x5   :  { %3806 = sst [smem:[#allocation9_spill]] %s3781_s4 }
   0x6   :  { %3807 = sst [smem:[#allocation10_spill]] %s3782_s5 }
   0x7   :  { %s3808_s26 = sld [smem:[#allocation5_spill]]  ;;  %vm174_vm0 = vcmask 523264  }
   0xd   :  { %v3035_v0 = vld [vmem:[%s3808_s26] sm:$0xff] }
   0xe   :  { %27 = vsyncpa [#allocation3], 0  ;;  %v173_v1 = vmul.f32 %v3035_v0, %v3035_v0  ;;  %v2917_v3 = vmov 0.0   ;;  %v76_v4 = vld [vmem:[%s3783_s6 + $0x38] sm:$0xff]  ;;  %v75_v5 = vld [vmem:[%s3783_s6 + $0x30] sm:$0xff]  ;;  %vm186_vm1 = vcmask 1041408  }
   0xf   :  { %2522 = vmatprep.subr.mxu1 %v2917_v3  ;;  %2515 = vmatprep.subr.mxu0 %v2917_v3  ;;  %v78_v6 = vld [vmem:[%s3784_s7 + $0x8] sm:$0x3]  ;;  %vm2918_vm2 = vmmov 0   ;;  %v77_v8 = vld [vmem:[%s3784_s7] sm:$0xff]  ;;  %vm182_vm3 = vcmask 80896   ;;  %s3809_s2 = sld [smem:[#allocation6_spill]] }
  0x10   :  { %v175_v2 = vsel %vm174_vm0, %v173_v1, 0.0  ;;  %2523 = vmatpush3.msra.mxu1 %v76_v4  ;;  %2519 = vmatprep.mubr.msk.f32.mxu0 %vm2918_vm2, %v2917_v3  ;;  %v74_v7 = vld [vmem:[%s3783_s6 + $0x28] sm:$0xff]  ;;  %v73_v10 = vld [vmem:[%s3783_s6 + $0x20] sm:$0xff]  ;;  %v72_v11 = vld [vmem:[%s3783_s6 + $0x18] sm:$0xff]  ;;  %vm360_vm4 = vcmask 1044480   ;;  %s3810_s24 = sld [smem:[#allocation7_spill]] }
  0x11   :  { %176 = vadd.xlane.f32.xlu0 %v175_v2  ;;  %2524 = vmatprep.subr.mxu1 %v2917_v3  ;;  %v71_v12 = vld [vmem:[%s3783_s6 + $0x10] sm:$0xff]  ;;  %v70_v13 = vld [vmem:[%s3783_s6 + $0x8] sm:$0xff]  ;;  %v69_v14 = vld [vmem:[%s3783_s6] sm:$0xff]  ;;  %vm350_vm5 = vcmask 39936   ;;  %s3811_s4 = sld [smem:[#allocation9_spill]]  ;;  %v2919_v44 = vmov 0  }
  0x12   :  { %2516 = vmatpush3.msk.msra.mxu0 %vm186_vm1, %v78_v6  ;;  %2525 = vmatpush3.msra.mxu1 %v75_v5  ;;  %v80_v15 = vld [vmem:[%s3786_s9] sm:$0x1f]  ;;  %v3100_v17 = vld [vmem:[%s3788_s11 + $0x28] sm:$0xff]  ;;  %v3143_v27 = vld [vmem:[%s3789_s12 + $0x18] sm:$0xff]  ;;  %vm447_vm6 = vcmask 392192   ;;  %vm709_vm7 = vcmask 261120   ;;  %v120_v6 = vlaneseq }
  0x13   :  { %2517 = vmatprep.subr.mxu0 %v2917_v3  ;;  %2526 = vmatprep.subr.mxu1 %v2917_v3  ;;  %v3120_v20 = vld [vmem:[%s3788_s11 + $0x20] sm:$0xff]  ;;  %v3128_v25 = vld [vmem:[%s3789_s12 + $0x28] sm:$0xff]  ;;  %v3152_v30 = vld [vmem:[%s3788_s11 + $0x18] sm:$0xff]  ;;  %vm593_vm10 = vcmask 64512   ;;  %vm600_vm14 = vcmask 1043456   ;;  %s3813_s28 = sld [smem:[#allocation10_spill]] }
  0x14   :  { %2518 = vmatpush3.msra.mxu0 %v77_v8  ;;  %2527 = vmatpush3.msra.mxu1 %v74_v7  ;;  %v3134_v26 = vld [vmem:[%s3789_s12 + $0x20] sm:$0xff]  ;;  %v3158_v31 = vld [vmem:[%s3789_s12 + $0x10] sm:$0xff]  ;;  %v3172_v33 = vld [vmem:[%s3789_s12 + $0x8] sm:$0xff]  ;;  %vm816_vm1 = vcmask 195584  }
  0x15   :  { %v181_v9 = vld [vmem:[%s3809_s2] sm:$0xff]  ;;  %2528 = vmatprep.subr.mxu1 %v2917_v3  ;;  %2538 = vmatprep.mubr.msk.f32.mxu1 %vm2918_vm2, %v2917_v3  ;;  %v3165_v32 = vld [vmem:[%s3788_s11 + $0x10] sm:$0xff]  ;;  %v3179_v34 = vld [vmem:[%s3788_s11 + $0x8] sm:$0xff] }
  0x16   :  { %2520 = vmatmul.mubr.msk.f32.vlgmr.msra.gmra.mxu0 %vm182_vm3, %v181_v9  ;;  %2529 = vmatpush3.msra.mxu1 %v73_v10  ;;  %v341_v16 = vld [vmem:[%s3810_s24] sm:$0xff]  ;;  %v342_v18 = vld [vmem:[%s3810_s24 + $0x8] sm:$0xff]  ;;  %v343_v19 = vld [vmem:[%s3810_s24 + $0x10] sm:$0xff]  ;;  %s3812_s24 = sld [smem:[#allocation8_spill]]  ;;  %v121_v10 = vand.u32 127, %v120_v6 }
  0x17   :  { %2541 = vmatprep.subr.mxu0 %v2917_v3  ;;  %2530 = vmatprep.subr.mxu1 %v2917_v3  ;;  %v3186_v35 = vld [vmem:[%s3789_s12] sm:$0xff]  ;;  %v143_v43 = vld [vmem:[%s3811_s4 + $0x8] sm:$0xff]  ;;  %v144_v46 = vld [vmem:[%s3811_s4 + $0x10] sm:$0xff] }
  0x18   :  { %2543 = vmatprep.mubr.msk.f32.mxu0 %vm2918_vm2, %v2917_v3  ;;  %2531 = vmatpush3.msra.mxu1 %v72_v11  ;;  %v3193_v36 = vld [vmem:[%s3788_s11] sm:$0xff]  ;;  %v3226_v57 = vld [vmem:[%s3790_s13 + $0x18] sm:$0xff]  ;;  %v3235_v59 = vld [vmem:[%s3790_s13 + $0x10] sm:$0xff] }
  0x19   :  { %2532 = vmatprep.subr.mxu1 %v2917_v3  ;;  %2542 = vmatpush3.msk.msra.mxu0 %vm360_vm4, %v80_v15  ;;  %v142_v45 = vld [vmem:[%s3811_s4] sm:$0xff]  ;;  %v3244_v60 = vld [vmem:[%s3790_s13 + $0x8] sm:$0xff]  ;;  %v3280_v5 = vld [vmem:[%s3792_s15 + $0x18] sm:$0xff] }
  0x1a   :  { %2533 = vmatpush3.msra.mxu1 %v71_v12  ;;  %2544 = vmatmul.mubr.msk.f32.vlgmr.msra.gmra.mxu0 %vm350_vm5, %v341_v16  ;;  %v2311_v50 = vld [vmem:[%s3785_s8] ss:$0 sm:$0xff]  ;;  %v3291_v8 = vld [vmem:[%s3792_s15 + $0x10] sm:$0xff]  ;;  %v3300_v9 = vld [vmem:[%s3792_s15 + $0x8] sm:$0xff] }
  0x1b   :  { %2534 = vmatprep.subr.mxu1 %v2917_v3  ;;  %2552 = vmatprep.subr.mxu0 %v2917_v3  ;;  %v2312_v55 = vld [vmem:[%s3787_s10] ss:$0 sm:$0xff] }
  0x1c   :  { %2535 = vmatpush3.msra.mxu1 %v70_v13  ;;  %2546 = vmatprep.mubr.msk.f32.mxu0 %vm2918_vm2, %v2917_v3  ;;  %v122_v47 = vld [vmem:[%s3812_s24] sm:$0xff]  ;;  %v123_v48 = vld [vmem:[%s3812_s24 + $0x8] sm:$0xff]  ;;  %v124_v49 = vld [vmem:[%s3812_s24 + $0x10] sm:$0xff] }
  0x1d   :  { %2536 = vmatprep.subr.mxu1 %v2917_v3  ;;  %2553 = vmatpush3.msra.mxu0 %v3100_v17  ;;  %v3253_v63 = vld [vmem:[%s3790_s13] sm:$0xff] }
  0x1e   :  { %2537 = vmatpush3.msra.mxu1 %v69_v14  ;;  %2554 = vmatprep.subr.mxu0 %v2917_v3  ;;  %v3271_v4 = vld [vmem:[%s3792_s15 + $0x20] sm:$0xff] }
  0x1f   :  { %2567 = vmatprep.subr.mxu1 %v2917_v3  ;;  %2547 = vmatmul.mubr.msk.f32.gmra.mxu0 %vm350_vm5, %v342_v18  ;;  %v3310_v11 = vld [vmem:[%s3792_s15] sm:$0xff] }
  0x20   :  { %2549 = vmatprep.mubr.msk.f32.mxu0 %vm2918_vm2, %v2917_v3  ;;  %2555 = vmatpush3.msra.mxu0 %v3120_v20 }
  0x21   :  { %2556 = vmatprep.subr.mxu0 %v2917_v3  ;;  %2876 = vset.pattern.permute.xlu1 %v2919_v44 }
  0x22   :  { %2557 = vmatpush3.msra.mxu0 %v3152_v30  ;;  %2875 = vset.pattern.permute.xlu0 %v2919_v44 }
  0x23   :  { %2550 = vmatmul.mubr.msk.f32.gmra.mxu0 %vm350_vm5, %v343_v19  ;;  %2558 = vmatprep.subr.mxu0 %v2917_v3 }
  0x24   :  { %2564 = vmatprep.mubr.msk.f32.mxu0 %vm2918_vm2, %v2917_v3  ;;  %2559 = vmatpush3.msra.mxu0 %v3165_v32 }
  0x25   :  { %2560 = vmatprep.subr.mxu0 %v2917_v3  ;;  %149 = vperm.xlu1 %2876, %v143_v43  }
  0x26   :  { %2561 = vmatpush3.msra.mxu0 %v3179_v34 }
  0x27   :  { %2562 = vmatprep.subr.mxu0 %v2917_v3  ;;  %146 = vperm.xlu0 %2875, %v142_v45  }
  0x28   :  { %2563 = vmatpush3.msra.mxu0 %v3193_v36 }
  0x29   :  { %152 = vperm.xlu1 %2876, %v144_v46  }
  0x2d   :  { %126 = vperm.xlu1 %2876, %v122_v47  }
  0x31   :  { %129 = vperm.xlu1 %2876, %v123_v48  }
  0x35   :  { %132 = vperm.xlu1 %2876, %v124_v49  }
  0x9a   :  { %v177_v21 = vpop.xlane.xlu0 %176 }
  0x9b   :  { %v178_v22 = vadd.f32 1e-24, %v177_v21 }
  0x9d   :  { %2877 = vrsqrt.f32 %v178_v22 }
  0xa0   :  { %v150_v12 = vpop.permute.xlu1 %149 }
  0xa1   :  { %vm155_vm8 = vcmp.eq.s32.totalorder %v121_v10, %v150_v12 }
  0xa2   :  { %v147_v13 = vpop.permute.xlu0 %146  ;;  %v158_v14 = vsel %vm155_vm8, 1.0, %v2917_v3 }
  0xa3   :  { %vm154_vm9 = vcmp.eq.s32.totalorder %v121_v10, %v147_v13 }
  0xa4   :  { %v157_v15 = vsel %vm154_vm9, 1.0, %v2917_v3  ;;  %v153_v18 = vpop.permute.xlu1 %152 }
  0xa5   :  { %v3321_v16 = vpack.c.bf16 %v158_v14, %v157_v15  ;;  %vm156_vm11 = vcmp.eq.s32.totalorder %v121_v10, %v153_v18  ;;  %v3356_v14 = vld [vmem:[%s3791_s14] ss:$0 sm:$0xff] }
  0xa8   :  { %v127_v19 = vpop.permute.xlu1 %126 }
  0xa9   :  { %vm134_vm12 = vcmp.eq.s32.totalorder %v121_v10, %v127_v19 }
  0xaa   :  { %v2878_v23 = vpop.eup %2877 }
  0xab   :  { %v180_v24 = vmul.f32 %v2878_v23, %v3035_v0  ;;  %v3260_v0 = vld [vmem:[%s3792_s15 + $0x28] sm:$0xff] }
  0xac   :  { %v130_v21 = vpop.permute.xlu1 %129 }
  0xad   :  { %2539 = vmatmul.mubr.msk.f32.vlgmr.msra.gmra.mxu1 %vm174_vm0, %v180_v24  ;;  %vm135_vm13 = vcmp.eq.s32.totalorder %v121_v10, %v130_v21 }
  0xae   :  { %2568 = vmatpush3.msra.mxu1 %v3128_v25  ;;  %2579 = vmatprep.mubr.msk.f32.mxu1 %vm2918_vm2, %v2917_v3 }
  0xaf   :  { %2569 = vmatprep.subr.mxu1 %v2917_v3 }
  0xb0   :  { %2570 = vmatpush3.msra.mxu1 %v3134_v26 }
  0xb1   :  { %2571 = vmatprep.subr.mxu1 %v2917_v3 }
  0xb2   :  { %2572 = vmatpush3.msra.mxu1 %v3143_v27 }
  0xb3   :  { %2573 = vmatprep.subr.mxu1 %v2917_v3 }
  0xb4   :  { %2574 = vmatpush3.msra.mxu1 %v3158_v31 }
  0xb5   :  { %2575 = vmatprep.subr.mxu1 %v2917_v3 }
  0xb6   :  { %2576 = vmatpush3.msra.mxu1 %v3172_v33 }
  0xb7   :  { %2577 = vmatprep.subr.mxu1 %v2917_v3 }
  0xb8   :  { %2578 = vmatpush3.msra.mxu1 %v3186_v35 }
  0xb9   :  { %2594 = vmatprep.subr.mxu1 %v2917_v3 }
  0xd6   :  { %v256_v28 = vpop.f32.mrf.mxu0 }
  0xd8   :  { %v2521_v29 = vpop.f32.mrf.mxu0 }
  0xda   :  { %v430_v37 = vpop.f32.mrf.mxu0 }
  0xdb   :  { %v431_v58 = vadd.f32 %v2312_v55, %v430_v37 }
  0xdc   :  { %v2545_v38 = vpop.f32.mrf.mxu0 }
  0xdd   :  { %v3247_v61 = vmax.f32 %v431_v58, 0.0  ;;  %v137_v38 = vsel %vm134_vm12, 1.0, %v2917_v3 }
  0xdf   :  { %v435_v39 = vpop.f32.mrf.mxu0 }
  0xe0   :  { %v436_v62 = vadd.f32 %v2312_v55, %v435_v39  ;;  %v138_v39 = vsel %vm135_vm13, 1.0, %v2917_v3 }
  0xe1   :  { %v2548_v40 = vpop.f32.mrf.mxu0  ;;  %v3336_v44 = vpack.c.bf16 %v138_v39, %v137_v38  ;;  %v2307_v38 = vld [vmem:[%s3813_s28] ss:$0 sm:$0xff] }
  0xe2   :  { %v3263_v1 = vmax.f32 %v436_v62, 0.0 }
  0xe3   :  { %v440_v41 = vpop.f32.mrf.mxu0 }
  0xe4   :  { %v441_v2 = vadd.f32 %v2312_v55, %v440_v41 }
  0xe5   :  { %v2551_v42 = vpop.f32.mrf.mxu0 }
  0xe6   :  { %v3283_v7 = vmax.f32 %v441_v2, 0.0  ;;  %v133_v42 = vpop.permute.xlu1 %132 }
  0xe7   :  { %vm136_vm15 = vcmp.eq.s32.totalorder %v121_v10, %v133_v42 }
  0xe8   :  { %v139_v47 = vsel %vm136_vm15, 1.0, %v2917_v3 }
 0x16d   :  { %v329_v51 = vpop.f32.mrf.mxu1 }
 0x16e   :  { %v330_v52 = vadd.f32 %v329_v51, %v256_v28  ;;  %v159_v28 = vsel %vm156_vm11, 1.0, %v2917_v3 }
 0x16f   :  { %v2540_v53 = vpop.f32.mrf.mxu1  ;;  %v3333_v43 = vpack.c.bf16 %v159_v28, %v159_v28  ;;  %v163_v28 = vshrl.u32 %v120_v6, 7 }
 0x170   :  { %v339_v54 = vadd.f32 %v2311_v50, %v330_v52  ;;  %v3345_v50 = vpack.c.bf16 %v139_v47, %v139_v47 }
 0x171   :  { %vm169_vm0 = vcmp.eq.s32.totalorder %v163_v28, %v2307_v38 }
 0x172   :  { %v3221_v56 = vmax.f32 %v339_v54, 0.0  ;;  %v170_v47 = vsel %vm169_vm0, 1.0, %v2917_v3 }
 0x174   :  { %2565 = vmatmul.mubr.msk.f32.vlgmr.msra.gmra.mxu0 %vm447_vm6, %v3221_v56  ;;  %2580 = vmatmul.mubr.msk.f32.vlgmr.msra.gmra.mxu1 %vm447_vm6, %v3221_v56 }
 0x175   :  { %2595 = vmatpush3.msra.mxu1 %v3226_v57  ;;  %2602 = vmatprep.mubr.msk.f32.mxu1 %vm2918_vm2, %v2917_v3 }
 0x176   :  { %2596 = vmatprep.subr.mxu1 %v2917_v3  ;;  %2584 = vmatprep.mubr.msk.bf16.mxu0 %vm593_vm10, %v3321_v16 }
 0x177   :  { %2597 = vmatpush3.msra.mxu1 %v3235_v59 }
 0x178   :  { %2598 = vmatprep.subr.mxu1 %v2917_v3 }
 0x179   :  { %2599 = vmatpush3.msra.mxu1 %v3244_v60 }
 0x17a   :  { %2600 = vmatprep.subr.mxu1 %v2917_v3 }
 0x17b   :  { %2601 = vmatpush3.msra.mxu1 %v3253_v63 }
 0x17c   :  { %2603 = vmatmul.mubr.msk.f32.vlgmr.msra.gmra.mxu1 %vm709_vm7, %v3247_v61  ;;  %2630 = vmatprep.subr.mxu1 %v2917_v3 }
 0x17d   :  { %2631 = vmatpush3.msra.mxu1 %v3260_v0  ;;  %2605 = vmatprep.mubr.msk.f32.mxu1 %vm2918_vm2, %v2917_v3 }
 0x17e   :  { %2632 = vmatprep.subr.mxu1 %v2917_v3 }
 0x17f   :  { %2633 = vmatpush3.msra.mxu1 %v3271_v4 }
 0x180   :  { %2606 = vmatmul.mubr.msk.f32.gmra.mxu1 %vm709_vm7, %v3263_v1  ;;  %2634 = vmatprep.subr.mxu1 %v2917_v3 }
 0x181   :  { %2635 = vmatpush3.msra.mxu1 %v3280_v5  ;;  %2608 = vmatprep.mubr.msk.f32.mxu1 %vm2918_vm2, %v2917_v3 }
 0x182   :  { %2636 = vmatprep.subr.mxu1 %v2917_v3 }
 0x183   :  { %2637 = vmatpush3.msra.mxu1 %v3291_v8 }
 0x184   :  { %2609 = vmatmul.mubr.msk.f32.gmra.mxu1 %vm709_vm7, %v3283_v7  ;;  %2638 = vmatprep.subr.mxu1 %v2917_v3 }
 0x185   :  { %2639 = vmatpush3.msra.mxu1 %v3300_v9  ;;  %2642 = vmatprep.mubr.msk.f32.mxu1 %vm2918_vm2, %v2917_v3 }
 0x186   :  { %2640 = vmatprep.subr.mxu1 %v2917_v3 }
 0x187   :  { %2641 = vmatpush3.msra.mxu1 %v3310_v11 }
 0x188   :  { %2643 = vmatmul.mubr.msk.f32.vlgmr.msra.gmra.mxu1 %vm447_vm6, %v3221_v56  ;;  %2660 = vmatprep.subr.mxu1 %v2917_v3 }
 0x189   :  { %2672 = vmatprep.mubr.msk.f32.mxu1 %vm2918_vm2, %v2917_v3 }
 0x234   :  { %v517_v22 = vpop.f32.mrf.mxu0  ;;  %v587_v23 = vpop.f32.mrf.mxu1 }
 0x235   :  { %v592_v24 = vpack.c.bf16 %v587_v23, %v587_v23  ;;  %v591_v40 = vpack.c.bf16 %v517_v22, %v517_v22 }
 0x236   :  { %v2566_v29 = vpop.f32.mrf.mxu0  ;;  %v2581_v37 = vpop.f32.mrf.mxu1 }
 0x237   :  { %v602_v41 = vsel %vm600_vm14, %v592_v24, 0  ;;  %2866 = vmatprep.subr.msk.bf16.mxu0 %vm600_vm14, %v592_v24  ;;  %v659_v45 = vsel %vm600_vm14, %v591_v40, 0 }
 0x238   :  { %2583 = vmatpush3.bf16.msra.mxu0 %v602_v41 }
 0x239   :  { %2867 = vmatprep.subr.msk.bf16.mxu0 %vm600_vm14, %v591_v40 }
 0x23b   :  { %2585 = vmatmul.mubr.msk.bf16.vlgmr.msra.gmra.mxu0 %vm593_vm10, %v3333_v43 }
 0x23c   :  { %v785_v46 = vpop.f32.mrf.mxu1  ;;  %2589 = vmatpush3.bf16.msra.mxu0 %v659_v45  ;;  %2590 = vmatprep.mubr.msk.bf16.mxu0 %vm593_vm10, %v3336_v44 }
 0x23d   :  { %2611 = vmatprep.subr.bf16.mxu0 %v2917_v3 }
 0x23e   :  { %v2604_v48 = vpop.f32.mrf.mxu1 }
 0x240   :  { %v790_v49 = vpop.f32.mrf.mxu1 }
 0x242   :  { %v2607_v51 = vpop.f32.mrf.mxu1 }
 0x243   :  { %2591 = vmatmul.mubr.msk.bf16.vlgmr.msra.gmra.mxu0 %vm593_vm10, %v3345_v50  ;;  %v3388_v51 = vld [vmem:[%s3793_s16 + $0x18] sm:$0xff] }
 0x244   :  { %v795_v52 = vpop.f32.mrf.mxu1  ;;  %2615 = vmatprep.mubr.msk.bf16.mxu0 %vm2918_vm2, %v2917_v3 }
 0x246   :  { %v2610_v53 = vpop.f32.mrf.mxu1 }
 0x247   :  { %v3404_v53 = vld [vmem:[%s3793_s16 + $0x8] sm:$0xff] }
 0x248   :  { %v3351_v54 = vpop.f32.mrf.mxu1 }
 0x24a   :  { %v2644_v55 = vpop.f32.mrf.mxu1 }
 0x24b   :  { %v3413_v55 = vld [vmem:[%s3793_s16] sm:$0xff] }
 0x2fb   :  { %v2586_v58 = vpop.f32.mrf.mxu0 }
 0x2fd   :  { %v638_v62 = vpop.f32.mrf.mxu0 }
 0x2ff   :  { %v2587_v2 = vpop.f32.mrf.mxu0 }
 0x301   :  { %v641_v10 = vpop.f32.mrf.mxu0 }
 0x303   :  { %v2592_v12 = vpop.f32.mrf.mxu0 }
 0x304   :  { %v704_v13 = vadd.f32 %v2592_v12, %v2586_v58  ;;  %v3420_v58 = vld [vmem:[%s3795_s18 + $0x28] sm:$0xff] }
 0x305   :  { %v695_v15 = vpop.f32.mrf.mxu0  ;;  %2661 = vmatpush3.msra.mxu1 %v3420_v58 }
 0x306   :  { %v801_v18 = vadd.f32 %v795_v52, %v704_v13  ;;  %v696_v19 = vadd.f32 %v695_v15, %v638_v62  ;;  %v3395_v52 = vld [vmem:[%s3793_s16 + $0x10] sm:$0xff]  ;;  %v3426_v62 = vld [vmem:[%s3795_s18 + $0x20] sm:$0xff]  ;;  %2662 = vmatprep.subr.mxu1 %v2917_v3  ;;  %v3441_v15 = vld [vmem:[%s3795_s18 + $0x18] sm:$0xff] }
 0x307   :  { %v2593_v21 = vpop.f32.mrf.mxu0  ;;  %2663 = vmatpush3.msra.mxu1 %v3426_v62 }
 0x308   :  { %v810_v22 = vadd.f32 %v3356_v14, %v801_v18  ;;  %v799_v23 = vadd.f32 %v785_v46, %v696_v19  ;;  %2664 = vmatprep.subr.mxu1 %v2917_v3  ;;  %v3449_v18 = vld [vmem:[%s3795_s18 + $0x10] sm:$0xff]  ;;  %v3458_v19 = vld [vmem:[%s3795_s18 + $0x8] sm:$0xff]  ;;  %v3467_v21 = vld [vmem:[%s3795_s18] sm:$0xff] }
 0x309   :  { %v698_v24 = vpop.f32.mrf.mxu0  ;;  %2665 = vmatpush3.msra.mxu1 %v3441_v15 }
 0x30a   :  { %v3360_v29 = vmax.f32 %v810_v22, 0.0  ;;  %v699_v37 = vadd.f32 %v698_v24, %v641_v10  ;;  %v3366_v39 = vadd.f32 %v3356_v14, %v799_v23  ;;  %2666 = vmatprep.subr.mxu1 %v2917_v3  ;;  %v3477_v22 = vld [vmem:[%s3794_s17] ss:$0 sm:$0xff] }
 0x30b   :  { %2667 = vmatpush3.msra.mxu1 %v3449_v18 }
 0x30c   :  { %v800_v40 = vadd.f32 %v790_v49, %v699_v37  ;;  %v815_v41 = vpack.c.bf16 %v3360_v29, %v3360_v29  ;;  %v811_v45 = vmax.f32 %v3366_v39, 0.0  ;;  %v3382_v49 = vpack.c.bf16 %v170_v47, %v170_v47  ;;  %2668 = vmatprep.subr.mxu1 %v2917_v3  ;;  %v3506_v47 = vld [vmem:[%s3796_s19 + $0x8] sm:$0xff] }
 0x30d   :  { %2669 = vmatpush3.msra.mxu1 %v3458_v19 }
 0x30e   :  { %v3371_v42 = vadd.f32 %v3356_v14, %v800_v40  ;;  %v821_v6 = vsel %vm600_vm14, %v815_v41, 0  ;;  %2670 = vmatprep.subr.mxu1 %v2917_v3  ;;  %v3487_v41 = vld [vmem:[%s3796_s19 + $0x18] sm:$0xff] }
 0x30f   :  { %2612 = vmatpush3.bf16.msra.mxu0 %v821_v6  ;;  %2671 = vmatpush3.msra.mxu1 %v3467_v21 }
 0x310   :  { %v812_v46 = vmax.f32 %v3371_v42, 0.0  ;;  %2613 = vmatprep.subr.bf16.mxu0 %v2917_v3  ;;  %2692 = vmatprep.subr.mxu1 %v2917_v3  ;;  %v3549_v42 = vadd.f32 %v3360_v29, %v3283_v7 }
 0x312   :  { %v814_v48 = vpack.c.bf16 %v812_v46, %v811_v45  ;;  %v1263_v29 = vmul.f32 %v3549_v42, %v3549_v42 }
 0x314   :  { %2614 = vmatpush3.bf16.msra.mxu0 %v814_v48  ;;  %v3513_v48 = vadd.f32 %v811_v45, %v3247_v61  ;;  %v3533_v45 = vadd.f32 %v812_v46, %v3263_v1 }
 0x315   :  { %2619 = vmatprep.subr.mxu0 %v2917_v3 }
 0x316   :  { %v1261_v39 = vmul.f32 %v3513_v48, %v3513_v48  ;;  %v1262_v46 = vmul.f32 %v3533_v45, %v3533_v45 }
 0x317   :  { %2616 = vmatmul.mubr.msk.bf16.vlgmr.msra.gmra.mxu0 %vm816_vm1, %v3382_v49 }
 0x318   :  { %2620 = vmatpush3.msra.mxu0 %v3388_v51  ;;  %2627 = vmatprep.mubr.msk.f32.mxu0 %vm2918_vm2, %v2917_v3 }
 0x319   :  { %2621 = vmatprep.subr.mxu0 %v2917_v3 }
 0x31a   :  { %2622 = vmatpush3.msra.mxu0 %v3395_v52 }
 0x31b   :  { %2623 = vmatprep.subr.mxu0 %v2917_v3 }
 0x31c   :  { %2624 = vmatpush3.msra.mxu0 %v3404_v53 }
 0x31d   :  { %2625 = vmatprep.subr.mxu0 %v2917_v3 }
 0x31e   :  { %2626 = vmatpush3.msra.mxu0 %v3413_v55 }
 0x31f   :  { %2645 = vmatprep.subr.mxu0 %v2917_v3 }
 0x3d7   :  { %v857_v2 = vpop.f32.mrf.mxu0 }
 0x3d8   :  { %2628 = vmatmul.mubr.msk.f32.vlgmr.msra.gmra.mxu0 %vm709_vm7, %v857_v2  ;;  %v3520_v2 = vld [vmem:[%s3796_s19] sm:$0xff] }
 0x3d9   :  { %v2617_v10 = vpop.f32.mrf.mxu0  ;;  %2646 = vmatpush3.msra.mxu0 %v3420_v58  ;;  %2657 = vmatprep.mubr.msk.f32.mxu0 %vm2918_vm2, %v2917_v3 }
 0x3da   :  { %2647 = vmatprep.subr.mxu0 %v2917_v3 }
 0x3db   :  { %v860_v12 = vpop.f32.mrf.mxu0  ;;  %2648 = vmatpush3.msra.mxu0 %v3426_v62 }
 0x3dc   :  { %2649 = vmatprep.subr.mxu0 %v2917_v3 }
 0x3dd   :  { %v2618_v13 = vpop.f32.mrf.mxu0  ;;  %2650 = vmatpush3.msra.mxu0 %v3441_v15 }
 0x3de   :  { %2651 = vmatprep.subr.mxu0 %v2917_v3 }
 0x3df   :  { %2652 = vmatpush3.msra.mxu0 %v3449_v18 }
 0x3e0   :  { %2653 = vmatprep.subr.mxu0 %v2917_v3 }
 0x3e1   :  { %2654 = vmatpush3.msra.mxu0 %v3458_v19 }
 0x3e2   :  { %2655 = vmatprep.subr.mxu0 %v2917_v3 }
 0x3e3   :  { %2656 = vmatpush3.msra.mxu0 %v3467_v21 }
 0x3e4   :  { %2675 = vmatprep.subr.mxu0 %v2917_v3 }
 0x498   :  { %v932_v23 = vpop.f32.mrf.mxu0 }
 0x499   :  { %v1003_v24 = vadd.f32 %v3351_v54, %v932_v23  ;;  %v3496_v54 = vld [vmem:[%s3796_s19 + $0x10] sm:$0xff]  ;;  %s2920_s19 = smov [#allocation2]  }
 0x49a   :  { %v2629_v28 = vpop.f32.mrf.mxu0  ;;  %s2295_s8 = sshll.u32 %s2920_s19, 4  ;;  %s2296_s8 = int_to_ptr.vmem [resolvable:$true] %s2295_s8 }
 0x49b   :  { %v1012_v37 = vadd.f32 %v3477_v22, %v1003_v24  ;;  %s2895_s12 = scalar_lea.vmem %s2296_s8, 128  ;;  %p2900_p1 = scmp.lt.s32.totalorder %s2296_s8, %s2296_s8 }
 0x49c   :  { %p2896_p0 = scmp.ne.s32.totalorder %s2296_s8, %s2895_s12  ;;  %p2901_p2 = scmp.lt.s32.totalorder %s2895_s12, %s2895_s12 }
 0x49d   :  { %v1013_v38 = vmax.f32 %v1012_v37, 0.0 }
 0x49e   :  { %p2902_p3 = por %p2901_p2, %p2900_p1 }
 0x49f   :  { %v3482_v40 = vadd.f32 %v1013_v38, %v3221_v56 }
 0x4a0   :  { %p2903_p4 = pnand %p2902_p3, %p2896_p0 }
 0x4a1   :  { %v1088_v6 = vmul.f32 %v3482_v40, %v3482_v40  ;;  %2658 = vmatmul.mubr.msk.f32.vlgmr.msra.gmra.mxu0 %vm447_vm6, %v3482_v40 }
 0x4a2   :  { %2676 = vmatpush3.msra.mxu0 %v3487_v41  ;;  %2683 = vmatprep.mubr.msk.f32.mxu0 %vm2918_vm2, %v2917_v3 }
 0x4a3   :  { %2677 = vmatprep.subr.mxu0 %v2917_v3  ;;  %2673 = vmatmul.mubr.msk.f32.vlgmr.msra.gmra.mxu1 %vm447_vm6, %v1088_v6 }
 0x4a4   :  { %2678 = vmatpush3.msra.mxu0 %v3496_v54  ;;  %2693 = vmatpush3.msra.mxu1 %v3487_v41 }
 0x4a5   :  { %2679 = vmatprep.subr.mxu0 %v2917_v3  ;;  %2694 = vmatprep.subr.mxu1 %v2917_v3 }
 0x4a6   :  { %2680 = vmatpush3.msra.mxu0 %v3506_v47  ;;  %2695 = vmatpush3.msra.mxu1 %v3496_v54 }
 0x4a7   :  { %2681 = vmatprep.subr.mxu0 %v2917_v3  ;;  %2696 = vmatprep.subr.mxu1 %v2917_v3 }
 0x4a8   :  { %2682 = vmatpush3.msra.mxu0 %v3520_v2  ;;  %2697 = vmatpush3.msra.mxu1 %v3506_v47 }
 0x4a9   :  { %2684 = vmatmul.mubr.msk.f32.vlgmr.msra.gmra.mxu0 %vm709_vm7, %v3513_v48  ;;  %2698 = vmatprep.subr.mxu1 %v2917_v3 }
 0x4aa   :  { %2699 = vmatpush3.msra.mxu1 %v3520_v2  ;;  %2700 = vmatprep.mubr.msk.f32.mxu1 %vm2918_vm2, %v2917_v3 }
 0x4ab   :  { %2701 = vmatmul.mubr.msk.f32.vlgmr.msra.gmra.mxu1 %vm709_vm7, %v1261_v39  ;;  %2686 = vmatprep.mubr.msk.f32.mxu0 %vm2918_vm2, %v2917_v3 }
 0x4ac   :  { %2703 = vmatprep.mubr.msk.f32.mxu1 %vm2918_vm2, %v2917_v3  ;;  %2709 = vmatprep.subr.mxu0 %v2917_v3 }
 0x4ad   :  { %2687 = vmatmul.mubr.msk.f32.gmra.mxu0 %vm709_vm7, %v3533_v45  ;;  %2724 = vmatprep.subr.mxu1 %v2917_v3 }
 0x4ae   :  { %2689 = vmatprep.mubr.msk.f32.mxu0 %vm2918_vm2, %v2917_v3  ;;  %2710 = vmatpush3.msra.mxu0 %v3100_v17 }
 0x4af   :  { %2704 = vmatmul.mubr.msk.f32.gmra.mxu1 %vm709_vm7, %v1262_v46  ;;  %2711 = vmatprep.subr.mxu0 %v2917_v3 }
 0x4b0   :  { %2706 = vmatprep.mubr.msk.f32.mxu1 %vm2918_vm2, %v2917_v3  ;;  %2725 = vmatpush3.msra.mxu1 %v3128_v25 }
 0x4b1   :  { %2690 = vmatmul.mubr.msk.f32.gmra.mxu0 %vm709_vm7, %v3549_v42  ;;  %2726 = vmatprep.subr.mxu1 %v2917_v3 }
 0x4b2   :  { %2712 = vmatpush3.msra.mxu0 %v3120_v20  ;;  %2727 = vmatpush3.msra.mxu1 %v3134_v26 }
 0x4b3   :  { %2707 = vmatmul.mubr.msk.f32.gmra.mxu1 %vm709_vm7, %v1263_v29  ;;  %2713 = vmatprep.subr.mxu0 %v2917_v3 }
 0x4b4   :  { %2728 = vmatprep.subr.mxu1 %v2917_v3  ;;  %2714 = vmatpush3.msra.mxu0 %v3152_v30 }
 0x4b5   :  { %2729 = vmatpush3.msra.mxu1 %v3143_v27  ;;  %2715 = vmatprep.subr.mxu0 %v2917_v3 }
 0x4b6   :  { %2730 = vmatprep.subr.mxu1 %v2917_v3  ;;  %2716 = vmatpush3.msra.mxu0 %v3165_v32 }
 0x4b7   :  { %2731 = vmatpush3.msra.mxu1 %v3158_v31  ;;  %2717 = vmatprep.subr.mxu0 %v2917_v3 }
 0x4b8   :  { %2732 = vmatprep.subr.mxu1 %v2917_v3  ;;  %2718 = vmatpush3.msra.mxu0 %v3179_v34 }
 0x4b9   :  { %2733 = vmatpush3.msra.mxu1 %v3172_v33  ;;  %2719 = vmatprep.subr.mxu0 %v2917_v3 }
 0x4ba   :  { %2734 = vmatprep.subr.mxu1 %v2917_v3  ;;  %2720 = vmatpush3.msra.mxu0 %v3193_v36 }
 0x4bb   :  { %2721 = vmatprep.mubr.msk.f32.mxu0 %vm2918_vm2, %v2917_v3  ;;  %2735 = vmatpush3.msra.mxu1 %v3186_v35 }
 0x4bc   :  { %2736 = vmatprep.mubr.msk.f32.mxu1 %vm2918_vm2, %v2917_v3 }
 0x561   :  { %v1084_v17 = vpop.f32.mrf.mxu0 }
 0x562   :  { %v1162_v20 = vmul.f32 %v1084_v17, %v1084_v17 }
 0x563   :  { %v2659_v25 = vpop.f32.mrf.mxu0  ;;  %v1158_v26 = vpop.f32.mrf.mxu1 }
 0x564   :  { %v1163_v27 = vsub.f32 %v1158_v26, %v1162_v20 }
 0x565   :  { %v2674_v30 = vpop.f32.mrf.mxu1 }
 0x566   :  { %v1164_v31 = vmax.f32 %v1163_v27, 0.0 }
 0x568   :  { %v1166_v32 = vadd.f32 1e-05, %v1164_v31 }
 0x569   :  { %v1247_v33 = vpop.f32.mrf.mxu0 }
 0x56a   :  { %2879 = vrsqrt.f32 %v1166_v32  ;;  %v1353_v34 = vmul.f32 %v1247_v33, %v1247_v33  ;;  %v1165_v32 = vsub.f32 %v3482_v40, %v1084_v17 }
 0x56b   :  { %v2685_v36 = vpop.f32.mrf.mxu0  ;;  %v1339_v10 = vpop.f32.mrf.mxu1 }
 0x56c   :  { %v1356_v12 = vsub.f32 %v1339_v10, %v1353_v34 }
 0x56d   :  { %v1252_v13 = vpop.f32.mrf.mxu0  ;;  %v2702_v23 = vpop.f32.mrf.mxu1 }
 0x56e   :  { %v1359_v35 = vmax.f32 %v1356_v12, 0.0  ;;  %v1354_v24 = vmul.f32 %v1252_v13, %v1252_v13  ;;  %v1362_v23 = vsub.f32 %v3513_v48, %v1247_v33  ;;  %v1363_v17 = vsub.f32 %v3533_v45, %v1252_v13 }
 0x56f   :  { %v2688_v28 = vpop.f32.mrf.mxu0  ;;  %v1344_v37 = vpop.f32.mrf.mxu1 }
 0x570   :  { %v1365_v38 = vadd.f32 1e-05, %v1359_v35  ;;  %v1357_v6 = vsub.f32 %v1344_v37, %v1354_v24 }
 0x571   :  { %v1257_v39 = vpop.f32.mrf.mxu0  ;;  %v2705_v46 = vpop.f32.mrf.mxu1 }
 0x572   :  { %2881 = vrsqrt.f32 %v1365_v38  ;;  %v1360_v29 = vmax.f32 %v1357_v6, 0.0  ;;  %v1355_v20 = vmul.f32 %v1257_v39, %v1257_v39  ;;  %v1364_v37 = vsub.f32 %v3549_v42, %v1257_v39 }
 0x573   :  { %v2691_v25 = vpop.f32.mrf.mxu0  ;;  %v1349_v26 = vpop.f32.mrf.mxu1 }
 0x574   :  { %v1366_v27 = vadd.f32 1e-05, %v1360_v29  ;;  %v1358_v30 = vsub.f32 %v1349_v26, %v1355_v20 }
 0x575   :  { %v2708_v31 = vpop.f32.mrf.mxu1 }
 0x576   :  { %2883 = vrsqrt.f32 %v1366_v27  ;;  %v1361_v34 = vmax.f32 %v1358_v30, 0.0 }
 0x577   :  { %v2880_v36 = vpop.eup %2879 }
 0x578   :  { %v1168_v10 = vmul.f32 %v2880_v36, %v1165_v32  ;;  %v1367_v12 = vadd.f32 1e-05, %v1361_v34 }
 0x57a   :  { %2885 = vrsqrt.f32 %v1367_v12  ;;  %2722 = vmatmul.mubr.msk.f32.vlgmr.msra.gmra.mxu0 %vm447_vm6, %v1168_v10  ;;  %2737 = vmatmul.mubr.msk.f32.vlgmr.msra.gmra.mxu1 %vm447_vm6, %v1168_v10 }
 0x57b   :  { %2741 = vmatprep.mubr.msk.bf16.mxu0 %vm593_vm10, %v3321_v16  ;;  %2747 = vmatprep.mubr.msk.bf16.mxu1 %vm593_vm10, %v3336_v44 }
 0x57f   :  { %v2882_v35 = vpop.eup %2881 }
 0x580   :  { %v1371_v40 = vmul.f32 %v2882_v35, %v1362_v23 }
 0x583   :  { %v2884_v24 = vpop.eup %2883 }
 0x584   :  { %v1372_v28 = vmul.f32 %v2884_v24, %v1363_v17 }
 0x587   :  { %v2886_v38 = vpop.eup %2885 }
 0x588   :  { %v1373_v6 = vmul.f32 %v2886_v38, %v1364_v37 }
 0x63a   :  { %v1443_v46 = vpop.f32.mrf.mxu0  ;;  %v1513_v29 = vpop.f32.mrf.mxu1 }
 0x63b   :  { %v1517_v20 = vpack.c.bf16 %v1443_v46, %v1443_v46  ;;  %v1518_v25 = vpack.c.bf16 %v1513_v29, %v1513_v29 }
 0x63c   :  { %v2723_v16 = vpop.f32.mrf.mxu0  ;;  %v2738_v26 = vpop.f32.mrf.mxu1 }
 0x63d   :  { %v1571_v44 = vsel %vm600_vm14, %v1517_v20, 0  ;;  %v1520_v48 = vsel %vm600_vm14, %v1518_v25, 0  ;;  %2868 = vmatprep.subr.msk.bf16.mxu0 %vm600_vm14, %v1518_v25  ;;  %2869 = vmatprep.subr.msk.bf16.mxu1 %vm600_vm14, %v1517_v20 }
 0x63e   :  { %2740 = vmatpush3.bf16.msra.mxu0 %v1520_v48  ;;  %2746 = vmatpush3.bf16.msra.mxu1 %v1571_v44 }
 0x63f   :  { %2751 = vmatprep.subr.mxu0 %v2917_v3  ;;  %2768 = vmatprep.subr.bf16.mxu1 %v2917_v3 }
 0x641   :  { %2742 = vmatmul.mubr.msk.bf16.vlgmr.msra.gmra.mxu0 %vm593_vm10, %v3333_v43  ;;  %2748 = vmatmul.mubr.msk.bf16.vlgmr.msra.gmra.mxu1 %vm593_vm10, %v3345_v50 }
 0x642   :  { %2752 = vmatpush3.msra.mxu0 %v3226_v57  ;;  %2759 = vmatprep.mubr.msk.f32.mxu0 %vm2918_vm2, %v2917_v3 }
 0x643   :  { %2753 = vmatprep.subr.mxu0 %v2917_v3  ;;  %2772 = vmatprep.mubr.msk.bf16.mxu1 %vm2918_vm2, %v2917_v3 }
 0x644   :  { %2754 = vmatpush3.msra.mxu0 %v3235_v59 }
 0x645   :  { %2755 = vmatprep.subr.mxu0 %v2917_v3 }
 0x646   :  { %2756 = vmatpush3.msra.mxu0 %v3244_v60 }
 0x647   :  { %2757 = vmatprep.subr.mxu0 %v2917_v3 }
 0x648   :  { %2758 = vmatpush3.msra.mxu0 %v3253_v63 }
 0x649   :  { %2760 = vmatmul.mubr.msk.f32.vlgmr.msra.gmra.mxu0 %vm709_vm7, %v1371_v40  ;;  %2787 = vmatprep.subr.mxu0 %v2917_v3 }
 0x64a   :  { %2788 = vmatpush3.msra.mxu0 %v3260_v0  ;;  %2762 = vmatprep.mubr.msk.f32.mxu0 %vm2918_vm2, %v2917_v3 }
 0x64b   :  { %2789 = vmatprep.subr.mxu0 %v2917_v3 }
 0x64c   :  { %2790 = vmatpush3.msra.mxu0 %v3271_v4 }
 0x64d   :  { %2763 = vmatmul.mubr.msk.f32.gmra.mxu0 %vm709_vm7, %v1372_v28  ;;  %2791 = vmatprep.subr.mxu0 %v2917_v3 }
 0x64e   :  { %2792 = vmatpush3.msra.mxu0 %v3280_v5  ;;  %2765 = vmatprep.mubr.msk.f32.mxu0 %vm2918_vm2, %v2917_v3 }
 0x64f   :  { %2793 = vmatprep.subr.mxu0 %v2917_v3 }
 0x650   :  { %2794 = vmatpush3.msra.mxu0 %v3291_v8 }
 0x651   :  { %2766 = vmatmul.mubr.msk.f32.gmra.mxu0 %vm709_vm7, %v1373_v6  ;;  %2795 = vmatprep.subr.mxu0 %v2917_v3 }
 0x652   :  { %2796 = vmatpush3.msra.mxu0 %v3300_v9  ;;  %2799 = vmatprep.mubr.msk.f32.mxu0 %vm2918_vm2, %v2917_v3 }
 0x653   :  { %2797 = vmatprep.subr.mxu0 %v2917_v3 }
 0x654   :  { %2798 = vmatpush3.msra.mxu0 %v3310_v11 }
 0x655   :  { %2800 = vmatmul.mubr.msk.f32.vlgmr.msra.gmra.mxu0 %vm447_vm6, %v1168_v10  ;;  %2817 = vmatprep.subr.mxu0 %v2917_v3 }
 0x656   :  { %2818 = vmatpush3.msra.mxu0 %v3420_v58  ;;  %2829 = vmatprep.mubr.msk.f32.mxu0 %vm2918_vm2, %v2917_v3 }
 0x657   :  { %2819 = vmatprep.subr.mxu0 %v2917_v3 }
 0x658   :  { %2820 = vmatpush3.msra.mxu0 %v3426_v62 }
 0x659   :  { %2821 = vmatprep.subr.mxu0 %v2917_v3 }
 0x65a   :  { %2822 = vmatpush3.msra.mxu0 %v3441_v15 }
 0x65b   :  { %2823 = vmatprep.subr.mxu0 %v2917_v3 }
 0x65c   :  { %2824 = vmatpush3.msra.mxu0 %v3449_v18 }
 0x65d   :  { %2825 = vmatprep.subr.mxu0 %v2917_v3 }
 0x65e   :  { %2826 = vmatpush3.msra.mxu0 %v3458_v19 }
 0x65f   :  { %2827 = vmatprep.subr.mxu0 %v2917_v3 }
 0x660   :  { %2828 = vmatpush3.msra.mxu0 %v3467_v21 }
 0x661   :  { %2849 = vmatprep.subr.mxu0 %v2917_v3 }
 0x701   :  { %v2743_v57 = vpop.f32.mrf.mxu0  ;;  %v2749_v59 = vpop.f32.mrf.mxu1 }
 0x702   :  { %v1616_v42 = vadd.f32 %v2749_v59, %v2743_v57 }
 0x703   :  { %v1556_v60 = vpop.f32.mrf.mxu0  ;;  %v1607_v63 = vpop.f32.mrf.mxu1 }
 0x704   :  { %v1608_v33 = vadd.f32 %v1607_v63, %v1556_v60 }
 0x705   :  { %v2744_v0 = vpop.f32.mrf.mxu0  ;;  %v2750_v4 = vpop.f32.mrf.mxu1 }
 0x707   :  { %v1559_v5 = vpop.f32.mrf.mxu0  ;;  %v1610_v11 = vpop.f32.mrf.mxu1 }
 0x708   :  { %v1611_v50 = vadd.f32 %v1610_v11, %v1559_v5 }
 0x709   :  { %v1696_v8 = vpop.f32.mrf.mxu0 }
 0x70a   :  { %v1710_v30 = vadd.f32 %v1696_v8, %v1608_v33 }
 0x70b   :  { %v2761_v9 = vpop.f32.mrf.mxu0 }
 0x70c   :  { %v1713_v12 = vadd.f32 %v3356_v14, %v1710_v30 }
 0x70d   :  { %v1701_v43 = vpop.f32.mrf.mxu0 }
 0x70e   :  { %v1711_v13 = vadd.f32 %v1701_v43, %v1611_v50  ;;  %v1716_v24 = vmax.f32 %v1713_v12, 0.0 }
 0x70f   :  { %v2764_v45 = vpop.f32.mrf.mxu0 }
 0x710   :  { %v3662_v34 = vadd.f32 %v3356_v14, %v1711_v13 }
 0x711   :  { %v1706_v39 = vpop.f32.mrf.mxu0 }
 0x712   :  { %v1712_v27 = vadd.f32 %v1706_v39, %v1616_v42  ;;  %v1717_v40 = vmax.f32 %v3662_v34, 0.0 }
 0x713   :  { %v2767_v31 = vpop.f32.mrf.mxu0 }
 0x714   :  { %v1715_v32 = vadd.f32 %v3356_v14, %v1712_v27  ;;  %v1719_v28 = vpack.c.bf16 %v1717_v40, %v1716_v24 }
 0x715   :  { %v1903_v36 = vpop.f32.mrf.mxu0 }
 0x716   :  { %v3664_v10 = vmax.f32 %v1715_v32, 0.0 }
 0x717   :  { %v2801_v23 = vpop.f32.mrf.mxu0 }
 0x718   :  { %v1720_v35 = vpack.c.bf16 %v3664_v10, %v3664_v10 }
 0x71a   :  { %v1722_v17 = vsel %vm600_vm14, %v1720_v35, 0 }
 0x71b   :  { %2769 = vmatpush3.bf16.msra.mxu1 %v1722_v17 }
 0x71c   :  { %2770 = vmatprep.subr.bf16.mxu1 %v2917_v3 }
 0x71f   :  { %2771 = vmatpush3.bf16.msra.mxu1 %v1719_v28 }
 0x720   :  { %2776 = vmatprep.subr.mxu1 %v2917_v3 }
 0x722   :  { %2773 = vmatmul.mubr.msk.bf16.vlgmr.msra.gmra.mxu1 %vm816_vm1, %v3382_v49 }
 0x723   :  { %2777 = vmatpush3.msra.mxu1 %v3388_v51  ;;  %2784 = vmatprep.mubr.msk.f32.mxu1 %vm2918_vm2, %v2917_v3 }
 0x724   :  { %2778 = vmatprep.subr.mxu1 %v2917_v3 }
 0x725   :  { %2779 = vmatpush3.msra.mxu1 %v3395_v52 }
 0x726   :  { %2780 = vmatprep.subr.mxu1 %v2917_v3 }
 0x727   :  { %2781 = vmatpush3.msra.mxu1 %v3404_v53 }
 0x728   :  { %2782 = vmatprep.subr.mxu1 %v2917_v3 }
 0x729   :  { %2783 = vmatpush3.msra.mxu1 %v3413_v55 }
 0x72a   :  { %2802 = vmatprep.subr.mxu1 %v2917_v3 }
 0x7e2   :  { %v1758_v14 = vpop.f32.mrf.mxu1 }
 0x7e3   :  { %2785 = vmatmul.mubr.msk.f32.vlgmr.msra.gmra.mxu1 %vm709_vm7, %v1758_v14 }
 0x7e4   :  { %v2774_v49 = vpop.f32.mrf.mxu1  ;;  %2803 = vmatpush3.msra.mxu1 %v3420_v58  ;;  %2814 = vmatprep.mubr.msk.f32.mxu1 %vm2918_vm2, %v2917_v3 }
 0x7e5   :  { %2804 = vmatprep.subr.mxu1 %v2917_v3 }
 0x7e6   :  { %v1761_v51 = vpop.f32.mrf.mxu1  ;;  %2805 = vmatpush3.msra.mxu1 %v3426_v62 }
 0x7e7   :  { %2806 = vmatprep.subr.mxu1 %v2917_v3 }
 0x7e8   :  { %v2775_v52 = vpop.f32.mrf.mxu1  ;;  %2807 = vmatpush3.msra.mxu1 %v3441_v15 }
 0x7e9   :  { %2808 = vmatprep.subr.mxu1 %v2917_v3 }
 0x7ea   :  { %2809 = vmatpush3.msra.mxu1 %v3449_v18 }
 0x7eb   :  { %2810 = vmatprep.subr.mxu1 %v2917_v3 }
 0x7ec   :  { %2811 = vmatpush3.msra.mxu1 %v3458_v19  ;;  %v3729_v19 = vadd.f32 %v1717_v40, %v3263_v1  ;;  %v3744_v1 = vadd.f32 %v3664_v10, %v3283_v7 }
 0x7ed   :  { %2812 = vmatprep.subr.mxu1 %v2917_v3 }
 0x7ee   :  { %2813 = vmatpush3.msra.mxu1 %v3467_v21  ;;  %v2157_v21 = vmul.f32 %v3729_v19, %v3729_v19  ;;  %v2158_v7 = vmul.f32 %v3744_v1, %v3744_v1 }
 0x7ef   :  { %2832 = vmatprep.subr.mxu1 %v2917_v3 }
 0x8a3   :  { %v1833_v53 = vpop.f32.mrf.mxu1 }
 0x8a4   :  { %v1904_v55 = vadd.f32 %v1903_v36, %v1833_v53 }
 0x8a5   :  { %v2786_v58 = vpop.f32.mrf.mxu1 }
 0x8a6   :  { %v1907_v62 = vadd.f32 %v3477_v22, %v1904_v55 }
 0x8a8   :  { %v1908_v15 = vmax.f32 %v1907_v62, 0.0 }
 0x8aa   :  { %v3702_v37 = vadd.f32 %v1908_v15, %v3221_v56  ;;  %v3716_v56 = vadd.f32 %v1716_v24, %v3247_v61 }
 0x8ac   :  { %v1983_v18 = vmul.f32 %v3702_v37, %v3702_v37  ;;  %2815 = vmatmul.mubr.msk.f32.vlgmr.msra.gmra.mxu1 %vm447_vm6, %v3702_v37  ;;  %v2156_v61 = vmul.f32 %v3716_v56, %v3716_v56 }
 0x8ad   :  { %2833 = vmatpush3.msra.mxu1 %v3487_v41  ;;  %2840 = vmatprep.mubr.msk.f32.mxu1 %vm2918_vm2, %v2917_v3 }
 0x8ae   :  { %2834 = vmatprep.subr.mxu1 %v2917_v3  ;;  %2830 = vmatmul.mubr.msk.f32.vlgmr.msra.gmra.mxu0 %vm447_vm6, %v1983_v18 }
 0x8af   :  { %2835 = vmatpush3.msra.mxu1 %v3496_v54  ;;  %2850 = vmatpush3.msra.mxu0 %v3487_v41 }
 0x8b0   :  { %2836 = vmatprep.subr.mxu1 %v2917_v3  ;;  %2851 = vmatprep.subr.mxu0 %v2917_v3 }
 0x8b1   :  { %2837 = vmatpush3.msra.mxu1 %v3506_v47  ;;  %2852 = vmatpush3.msra.mxu0 %v3496_v54 }
 0x8b2   :  { %2838 = vmatprep.subr.mxu1 %v2917_v3  ;;  %2853 = vmatprep.subr.mxu0 %v2917_v3 }
 0x8b3   :  { %2839 = vmatpush3.msra.mxu1 %v3520_v2  ;;  %2854 = vmatpush3.msra.mxu0 %v3506_v47 }
 0x8b4   :  { %2841 = vmatmul.mubr.msk.f32.vlgmr.msra.gmra.mxu1 %vm709_vm7, %v3716_v56  ;;  %2855 = vmatprep.subr.mxu0 %v2917_v3 }
 0x8b5   :  { %2856 = vmatpush3.msra.mxu0 %v3520_v2  ;;  %2857 = vmatprep.mubr.msk.f32.mxu0 %vm2918_vm2, %v2917_v3 }
 0x8b6   :  { %2858 = vmatmul.mubr.msk.f32.vlgmr.msra.gmra.mxu0 %vm709_vm7, %v2156_v61  ;;  %2843 = vmatprep.mubr.msk.f32.mxu1 %vm2918_vm2, %v2917_v3 }
 0x8b7   :  { %2860 = vmatprep.mubr.msk.f32.mxu0 %vm2918_vm2, %v2917_v3 }
 0x8b8   :  { %2844 = vmatmul.mubr.msk.f32.gmra.mxu1 %vm709_vm7, %v3729_v19 }
 0x8b9   :  { %2846 = vmatprep.mubr.msk.f32.mxu1 %vm2918_vm2, %v2917_v3 }
 0x8ba   :  { %2861 = vmatmul.mubr.msk.f32.gmra.mxu0 %vm709_vm7, %v2157_v21 }
 0x8bb   :  { %2863 = vmatprep.mubr.msk.f32.mxu0 %vm2918_vm2, %v2917_v3 }
 0x8bc   :  { %2847 = vmatmul.mubr.msk.f32.gmra.mxu1 %vm709_vm7, %v3744_v1 }
 0x8be   :  { %2864 = vmatmul.mubr.msk.f32.gmra.mxu0 %vm709_vm7, %v2158_v7 }
 0x96c   :  { %v1979_v22 = vpop.f32.mrf.mxu1 }
 0x96d   :  { %v2057_v41 = vmul.f32 %v1979_v22, %v1979_v22  ;;  %v2060_v33 = vsub.f32 %v3702_v37, %v1979_v22 }
 0x96e   :  { %v2816_v54 = vpop.f32.mrf.mxu1  ;;  %v2053_v47 = vpop.f32.mrf.mxu0 }
 0x96f   :  { %v2058_v2 = vsub.f32 %v2053_v47, %v2057_v41 }
 0x970   :  { %v2831_v38 = vpop.f32.mrf.mxu0 }
 0x971   :  { %v2059_v6 = vmax.f32 %v2058_v2, 0.0 }
 0x973   :  { %v2061_v46 = vadd.f32 1e-05, %v2059_v6 }
 0x974   :  { %v2142_v29 = vpop.f32.mrf.mxu1 }
 0x975   :  { %2887 = vrsqrt.f32 %v2061_v46  ;;  %v2248_v20 = vmul.f32 %v2142_v29, %v2142_v29  ;;  %v2257_v31 = vsub.f32 %v3716_v56, %v2142_v29 }
 0x976   :  { %v2842_v3 = vpop.f32.mrf.mxu1  ;;  %v2234_v25 = vpop.f32.mrf.mxu0 }
 0x977   :  { %v2251_v16 = vsub.f32 %v2234_v25, %v2248_v20 }
 0x978   :  { %v2147_v26 = vpop.f32.mrf.mxu1  ;;  %v2859_v44 = vpop.f32.mrf.mxu0 }
 0x979   :  { %v2254_v48 = vmax.f32 %v2251_v16, 0.0  ;;  %v2249_v57 = vmul.f32 %v2147_v26, %v2147_v26 }
 0x97a   :  { %v2845_v59 = vpop.f32.mrf.mxu1  ;;  %v2239_v60 = vpop.f32.mrf.mxu0 }
 0x97b   :  { %v2260_v63 = vadd.f32 1e-05, %v2254_v48  ;;  %v2252_v0 = vsub.f32 %v2239_v60, %v2249_v57 }
 0x97c   :  { %v2152_v4 = vpop.f32.mrf.mxu1  ;;  %v2862_v5 = vpop.f32.mrf.mxu0 }
 0x97d   :  { %2889 = vrsqrt.f32 %v2260_v63  ;;  %v2255_v8 = vmax.f32 %v2252_v0, 0.0  ;;  %v2250_v9 = vmul.f32 %v2152_v4, %v2152_v4 }
 0x97e   :  { %v2848_v11 = vpop.f32.mrf.mxu1  ;;  %v2244_v43 = vpop.f32.mrf.mxu0 }
 0x97f   :  { %v2261_v50 = vadd.f32 1e-05, %v2255_v8  ;;  %v2253_v45 = vsub.f32 %v2244_v43, %v2250_v9 }
 0x980   :  { %v2865_v42 = vpop.f32.mrf.mxu0 }
 0x981   :  { %2891 = vrsqrt.f32 %v2261_v50  ;;  %v2256_v13 = vmax.f32 %v2253_v45, 0.0 }
 0x982   :  { %v2888_v39 = vpop.eup %2887 }
 0x983   :  { %v2262_v27 = vadd.f32 1e-05, %v2256_v13  ;;  %v2063_v30 = vmul.f32 %v2888_v39, %v2060_v33 }
 0x985   :  { %2893 = vrsqrt.f32 %v2262_v27  ;;  %2269 = vst.msk [vmem:[#allocation2] sm:$0xff] %vm447_vm6, %v2063_v30 }
 0x98a   :  { %v2890_v32 = vpop.eup %2889 }
 0x98b   :  { %2906 = shalt.err (!%p2903_p4)
}
 0x98c   :  { %2298 = dma.vmem_to_hbm [thread:$0]  %s2296_s8, 128, %s3797_s20, [#allocation3]   ;;  %v2266_v34 = vmul.f32 %v2890_v32, %v2257_v31  ;;  %v2258_v36 = vsub.f32 %v3729_v19, %v2147_v26  ;;  %v2259_v23 = vsub.f32 %v3744_v1, %v2152_v4  ;;  %vm2285_vm2 = vcmask 130048  }
 0x98d   :  { %s2921_s4 = smov 112  }
 0x98e   :  { %2273 = vrot.lane.b32.xlu1 %v2266_v34, %s2921_s4  ;;  %v2892_v10 = vpop.eup %2891 }
 0x98f   :  { %v2267_v12 = vmul.f32 %v2892_v10, %v2258_v36 }
 0x992   :  { %2275 = vrot.lane.b32.xlu1 %v2267_v12, %s2921_s4  ;;  %v2894_v35 = vpop.eup %2893 }
 0x993   :  { %v2268_v40 = vmul.f32 %v2894_v35, %v2259_v23 }
 0x996   :  { %2277 = vrot.lane.b32.xlu1 %v2268_v40, %s2921_s4 }
 0xa00   :  { %v2274_v17 = vpop.permute.xlu1 %2273 }
 0xa01   :  { %v2282_v24 = vadd.f32 %v2274_v17, %v2266_v34 }
 0xa03   :  { %2286 = vst.msk [vmem:[%s3798_s21] sm:$0xff] %vm2285_vm2, %v2282_v24 }
 0xa04   :  { %v2276_v28 = vpop.permute.xlu1 %2275 }
 0xa05   :  { %v2283_v14 = vadd.f32 %v2276_v28, %v2267_v12 }
 0xa07   :  { %2287 = vst.msk [vmem:[%s3798_s21 + $0x8] sm:$0xff] %vm2285_vm2, %v2283_v14 }
 0xa08   :  { %v2278_v49 = vpop.permute.xlu1 %2277 }
 0xa09   :  { %v2284_v51 = vadd.f32 %v2278_v49, %v2268_v40 }
 0xa0b   :  { %2288 = vst.msk [vmem:[%s3798_s21 + $0x10] sm:$0xff] %vm2285_vm2, %v2284_v51 }
 0xa0c   :  { %2915 = dma.done.wait [#allocation3], 128  }
 0xa0d   :  { %2916 = vsyncadd [#allocation3], 4294967168 }
 0xa0e   :  { %2306 = vsyncpa [#allocation3], 1 }

</bundles_post_ra>
